<compile_context>
chip_gen: v7x
topology: tpu7x:2x2x1
jax: 0.10.0
libtpu: 0.0.40
codegen_flags: <defaults>
</compile_context>

<pallas_src>
import functools

import jax
import jax.numpy as jnp
import numpy as np
from jax.experimental import pallas as pl
from jax.experimental.pallas import tpu as pltpu


# ------------------------------ main hot-path kernel ------------------------------

def _memory_kernel(x_ref, w_ref, a_ref, s_ref, *out_refs, lambd, n_rows,
                   ragged, emit):
    x = x_ref[...]          # (tile_n, C)  MXU dtype
    if ragged:
        # Last tile may extend past N: zero the invalid rows so nothing odd
        # flows through exp/softmax (their writeback is masked anyway).
        tile_n = x_ref.shape[0]
        base = pl.program_id(0) * tile_n
        rows = jax.lax.broadcasted_iota(jnp.int32, (tile_n, 1), 0) + base
        x = jnp.where(rows < n_rows, x, jnp.zeros_like(x))

    w = w_ref[...]          # (M, C)  part-level memory
    a = a_ref[...]          # (G, C)  instance-level memory (G = num_cls*ptt_num)
    s = s_ref[...]          # (L, C)  class-level memory    (L = num_cls)

    def attend(q, mem):
        # logits[n, m] = sum_c q[n, c] * mem[m, c] -- contract C directly on
        # the MXU, no .T / vxpose of the bank. (At M=64/G=16/L=4 the MXU
        # columns are under-filled, but the kernel is memory-bound; amortizing
        # the stationary bank load over a large tile_n is the cheap lever.)
        logits = jax.lax.dot_general(
            q, mem, (((1,), (1,)), ((), ())),
            preferred_element_type=jnp.float32)                 # (tile_n, rows) f32

        # softmax -> hard-shrink -> L1 renormalize, fused:
        #   att_i > lambda  <=>  e_i > lambda * sum(e)
        # One EXACT reciprocal per attend on a (tile_n,1) vector (negligible
        # cost) so the error does not compound through the three stages.
        m = jnp.max(logits, axis=-1, keepdims=True)
        e = jnp.exp(logits - m)
        denom = jnp.sum(e, axis=-1, keepdims=True)
        if lambd > 0.0:
            e = jnp.where(e > lambd * denom, e, 0.0)
            denom = jnp.maximum(jnp.sum(e, axis=-1, keepdims=True), 1e-12)
        att = e * (1.0 / denom)

        # att @ mem : contraction over the memory rows, already un-transposed.
        return jnp.dot(att.astype(mem.dtype), mem,
                       preferred_element_type=jnp.float32)

    out_part = attend(x, w)
    out_ins = attend(out_part.astype(a.dtype), a)
    out_sem = attend(out_ins.astype(s.dtype), s)

    # Only the requested outputs are written back to HBM (lane-dense, C>=128),
    # and in the (narrow) output dtype to cut writeback bytes.
    outs = {"part": out_part, "ins": out_ins, "sem": out_sem}
    for name, ref in zip(emit, out_refs):
        ref[...] = outs[name].astype(ref.dtype)


# ------------------------------------ wrapper ------------------------------------

def _auto_tile_n(n_rows, max_tile=1024, min_steps=4):
    # Largest multiple-of-128 tile such that the grid has >= min_steps steps
    # (>= 2 steps per TensorCore on v7x so both cores can double-buffer);
    # big tiles amortize the ~0.35us/step overhead and the bank weight-loads.
    t = max_tile
    while t > 128 and pl.cdiv(n_rows, t) < min_steps:
        t //= 2
    return t


def memory_unit_forward(x, weight, conv_part_w, conv_part_b, conv_ins_w,
                        conv_ins_b, *, num_cls, ptt_num, part_num,
                        shrink_thres=0.0025, tile_n=None, use_bf16_mxu=True,
                        out_dtype=None, emit=("sem", "part", "ins")):
    N, C = x.shape
    L, T, P = num_cls, ptt_num, part_num
    G = L * T
    M = G * P
    assert weight.shape == (M, C)
    emit = tuple(emit)

    # ---- one-time memory-bank preprocessing in plain JAX (f32) ----
    # torch: weight.view(G, C, P).permute(0,2,1) -> Conv1d(P,P,1) -> sigmoid
    #        gate -> permute back -> avgpool over P
    w32 = weight.astype(jnp.float32)
    rp = jnp.transpose(w32.reshape(G, C, P), (0, 2, 1))                       # (G,P,C)
    conv_p = jnp.einsum("oi,gic->goc", conv_part_w, rp) + conv_part_b[None, :, None]
    part_att = jnp.mean(jax.nn.sigmoid(conv_p) * rp, axis=1)                  # (G,C)
    # torch: part_ins_att.view(L, T, C) -> Conv1d(T,T,1) -> sigmoid gate -> avgpool over T
    ri = part_att.reshape(L, T, C)
    conv_i = jnp.einsum("oi,lic->loc", conv_ins_w, ri) + conv_ins_b[None, :, None]
    sem_att = jnp.mean(jax.nn.sigmoid(conv_i) * ri, axis=1)                   # (L,C)

    # ---- MXU input dtype (bf16 default; accumulation / softmax stay f32) ----
    mxu_dtype = jnp.bfloat16 if use_bf16_mxu else jnp.float32
    if out_dtype is None:
        out_dtype = mxu_dtype          # halve output HBM writeback vs f32
    xk = x.astype(mxu_dtype)
    wk = weight.astype(mxu_dtype)
    ak = part_att.astype(mxu_dtype)
    sk = sem_att.astype(mxu_dtype)

    # ---- grid: no jnp.pad / no post-call slicing; ragged last tile masked ----
    if tile_n is None:
        tile_n = _auto_tile_n(N)
    grid = (pl.cdiv(N, tile_n),)
    ragged = (N % tile_n) != 0

    # ---- VMEM budget: double-buffered x tile + out tiles + banks; cap 48 MiB ----
    dsize = jnp.dtype(mxu_dtype).itemsize
    osize = jnp.dtype(out_dtype).itemsize
    vmem_need = (2 * (M + G + L) * C * dsize          # banks (2 buffers, DMA'd once)
                 + 2 * tile_n * C * dsize             # x tile, double-buffered
                 + 2 * len(emit) * tile_n * C * osize)  # output tiles, double-buffered
    vmem_limit = int(min(48 * 2**20, max(32 * 2**20, 2 * vmem_need)))

    kernel = functools.partial(_memory_kernel, lambd=float(shrink_thres),
                               n_rows=N, ragged=ragged, emit=emit)
    out_shape = tuple(jax.ShapeDtypeStruct((N, C), out_dtype) for _ in emit)
    out_specs = [pl.BlockSpec((tile_n, C), lambda i: (i, 0)) for _ in emit]

    results = pl.pallas_call(
        kernel,
        out_shape=out_shape,
        grid_spec=pltpu.PrefetchScalarGridSpec(
            num_scalar_prefetch=0,
            grid=grid,
            in_specs=[
                pl.BlockSpec((tile_n, C), lambda i: (i, 0)),
                # Grid-invariant banks: constant index_maps -> fetched once by
                # the auto-pipeliner (megacore-safe, unlike a step-0 manual
                # copy). Their 2x residency is only (M+G+L)*C*itemsize, so we
                # deliberately skip pipeline_mode=pl.Buffered(1) here.
                pl.BlockSpec((M, C), lambda i: (0, 0)),
                pl.BlockSpec((G, C), lambda i: (0, 0)),
                pl.BlockSpec((L, C), lambda i: (0, 0)),
            ],
            out_specs=out_specs,
        ),
        compiler_params=pltpu.CompilerParams(
            dimension_semantics=("parallel",),
            vmem_limit_bytes=vmem_limit),
    )(xk, wk, ak, sk)

    # TODO(synk): the PyTorch `residual=True` branch references an undefined
    # variable `output` (upstream bug); only the residual=False path exists.
    return {"output_" + name: res for name, res in zip(emit, results)}


# ------------------------------- pure-JAX reference -------------------------------
# Faithful to the PyTorch forward. `mxu_dtype` optionally casts the matmul
# inputs the same way the kernel does so the bf16 path can be checked tightly;
# with mxu_dtype=float32 this is exactly the PyTorch (f32) computation.

def _reference(x, weight, wp, bp, wi, bi, L, T, P, lambd,
               mxu_dtype=jnp.float32):
    C = weight.shape[1]
    G = L * T

    def cast(v):
        return v.astype(mxu_dtype)

    def shrink_norm(logits):
        att = jax.nn.softmax(logits, axis=1)
        if lambd > 0:
            att = jnp.maximum(att - lambd, 0.0) * att / (jnp.abs(att - lambd) + 1e-12)
            att = att / jnp.maximum(jnp.sum(jnp.abs(att), axis=1, keepdims=True), 1e-12)
        return att

    def attend(q, mem):
        logits = jnp.dot(cast(q), cast(mem).T, preferred_element_type=jnp.float32)
        att = shrink_norm(logits)
        return jnp.dot(cast(att), cast(mem), preferred_element_type=jnp.float32)

    rp = jnp.transpose(weight.reshape(G, C, P), (0, 2, 1))              # (G,P,C)
    conv = jnp.einsum("oi,gic->goc", wp, rp) + bp[None, :, None]
    part_att = jnp.mean(jax.nn.sigmoid(conv) * rp, axis=1)              # (G,C)

    ri = part_att.reshape(L, T, C)
    conv2 = jnp.einsum("oi,lic->loc", wi, ri) + bi[None, :, None]
    sem_att = jnp.mean(jax.nn.sigmoid(conv2) * ri, axis=1)              # (L,C)

    out_part = attend(x, weight)
    out_ins = attend(out_part, part_att)
    out_sem = attend(out_ins, sem_att)
    return out_sem, out_part, out_ins


# --------------------------------------- main ---------------------------------------

if __name__ == "__main__":
    # small config: num_cls=4, ptt_num=4, part_num=4, fea_dim=128 -> M = 64
    num_cls, ptt_num, part_num, fea_dim = 4, 4, 4, 128
    L, T, P, C = num_cls, ptt_num, part_num, fea_dim
    M = L * T * P
    shrink_thres = 0.0025

    key = jax.random.PRNGKey(0)
    k_x, k_w, k_wp, k_bp, k_wi, k_bi = jax.random.split(key, 6)

    # input: NCHW (2, 128, 16, 16) -> NHWC -> (N*H*W, C) = (512, 128)
    x_nchw = jax.random.normal(k_x, (2, C, 16, 16), dtype=jnp.float32)
    x = jnp.transpose(x_nchw, (0, 2, 3, 1)).reshape(-1, C)

    # memory bank: uniform(-stdv, stdv), stdv = 1/sqrt(fea_dim)  (reset_parameters)
    stdv = 1.0 / np.sqrt(C)
    weight = jax.random.uniform(k_w, (M, C), jnp.float32, -stdv, stdv)

    # Conv1d(part_num, part_num, 1) and Conv1d(ptt_num, ptt_num, 1) params
    bnd_p = 1.0 / np.sqrt(P)
    conv_part_w = jax.random.uniform(k_wp, (P, P), jnp.float32, -bnd_p, bnd_p)
    conv_part_b = jax.random.uniform(k_bp, (P,), jnp.float32, -bnd_p, bnd_p)
    bnd_i = 1.0 / np.sqrt(T)
    conv_ins_w = jax.random.uniform(k_wi, (T, T), jnp.float32, -bnd_i, bnd_i)
    conv_ins_b = jax.random.uniform(k_bi, (T,), jnp.float32, -bnd_i, bnd_i)

    # --- run 1: f32 MXU inputs + f32 outputs, vs PyTorch-faithful f32 reference ---
    out32 = memory_unit_forward(
        x, weight, conv_part_w, conv_part_b, conv_ins_w, conv_ins_b,
        num_cls=num_cls, ptt_num=ptt_num, part_num=part_num,
        shrink_thres=shrink_thres, use_bf16_mxu=False)
    jax.block_until_ready(out32)
    ref_sem, ref_part, ref_ins = _reference(
        x, weight, conv_part_w, conv_part_b, conv_ins_w, conv_ins_b,
        L, T, P, shrink_thres, mxu_dtype=jnp.float32)
    np.testing.assert_allclose(np.asarray(out32["output_part"]), np.asarray(ref_part),
                               rtol=1e-2, atol=1e-3)
    np.testing.assert_allclose(np.asarray(out32["output_ins"]), np.asarray(ref_ins),
                               rtol=1e-2, atol=1e-3)
    np.testing.assert_allclose(np.asarray(out32["output_sem"]), np.asarray(ref_sem),
                               rtol=1e-2, atol=1e-3)

    # --- run 2: default fast path (bf16 MXU inputs, bf16 outputs, all three) ---
    outbf = memory_unit_forward(
        x, weight, conv_part_w, conv_part_b, conv_ins_w, conv_ins_b,
        num_cls=num_cls, ptt_num=ptt_num, part_num=part_num,
        shrink_thres=shrink_thres, use_bf16_mxu=True)
    jax.block_until_ready(outbf)
    refb_sem, refb_part, refb_ins = _reference(
        x, weight, conv_part_w, conv_part_b, conv_ins_w, conv_ins_b,
        L, T, P, shrink_thres, mxu_dtype=jnp.bfloat16)
    np.testing.assert_allclose(np.asarray(outbf["output_part"], dtype=np.float32),
                               np.asarray(refb_part), rtol=2e-2, atol=2e-3)
    np.testing.assert_allclose(np.asarray(outbf["output_ins"], dtype=np.float32),
                               np.asarray(refb_ins), rtol=2e-2, atol=2e-3)
    np.testing.assert_allclose(np.asarray(outbf["output_sem"], dtype=np.float32),
                               np.asarray(refb_sem), rtol=2e-2, atol=2e-3)

    # --- run 3: downstream only needs output_sem -> skip HBM writeback of the rest ---
    outsem = memory_unit_forward(
        x, weight, conv_part_w, conv_part_b, conv_ins_w, conv_ins_b,
        num_cls=num_cls, ptt_num=ptt_num, part_num=part_num,
        shrink_thres=shrink_thres, use_bf16_mxu=True, emit=("sem",))
    jax.block_until_ready(outsem)
    np.testing.assert_allclose(np.asarray(outsem["output_sem"], dtype=np.float32),
                               np.asarray(refb_sem), rtol=2e-2, atol=2e-3)

    # --- run 4: ragged N (500 rows, not a multiple of tile_n) exercises the
    #     partial-last-tile path with in-kernel row masking, no pads / slices ---
    x_rag = x[:500]
    out_rag = memory_unit_forward(
        x_rag, weight, conv_part_w, conv_part_b, conv_ins_w, conv_ins_b,
        num_cls=num_cls, ptt_num=ptt_num, part_num=part_num,
        shrink_thres=shrink_thres, use_bf16_mxu=False)
    jax.block_until_ready(out_rag)
    rr_sem, rr_part, rr_ins = _reference(
        x_rag, weight, conv_part_w, conv_part_b, conv_ins_w, conv_ins_b,
        L, T, P, shrink_thres, mxu_dtype=jnp.float32)
    np.testing.assert_allclose(np.asarray(out_rag["output_part"]), np.asarray(rr_part),
                               rtol=1e-2, atol=1e-3)
    np.testing.assert_allclose(np.asarray(out_rag["output_sem"]), np.asarray(rr_sem),
                               rtol=1e-2, atol=1e-3)

    print("KERNEL_OK")
</pallas_src>

<mosaic_0001>
module attributes {stable_mosaic.version = 11 : i64} {
  func.func @_memory_kernel(%arg0: i32, %arg1: memref<128x128xf32, #tpu.memory_space<vmem>>, %arg2: memref<64x128xf32, #tpu.memory_space<vmem>>, %arg3: memref<16x128xf32, #tpu.memory_space<vmem>>, %arg4: memref<4x128xf32, #tpu.memory_space<vmem>>, %arg5: memref<128x128xf32, #tpu.memory_space<vmem>>, %arg6: memref<128x128xf32, #tpu.memory_space<vmem>>, %arg7: memref<128x128xf32, #tpu.memory_space<vmem>>) attributes {dimension_semantics = [#tpu.dimension_semantics<parallel>], iteration_bounds = array<i64: 4>, scalar_prefetch = 0 : i64, scratch_operands = 0 : i64, tpu.core_type = #tpu.core_type<tc>, window_params = [{transform_indices = @transform_0, window_bounds = array<i64: 128, 128>}, {pipeline_mode = #tpu.pipeline_mode<synchronous>, transform_indices = @transform_1, window_bounds = array<i64: 64, 128>}, {pipeline_mode = #tpu.pipeline_mode<synchronous>, transform_indices = @transform_2, window_bounds = array<i64: 16, 128>}, {pipeline_mode = #tpu.pipeline_mode<synchronous>, transform_indices = @transform_3, window_bounds = array<i64: 4, 128>}, {transform_indices = @transform_4, window_bounds = array<i64: 128, 128>}, {transform_indices = @transform_5, window_bounds = array<i64: 128, 128>}, {transform_indices = @transform_6, window_bounds = array<i64: 128, 128>}]} {
    %c0 = arith.constant 0 : index
    %c0_0 = arith.constant 0 : index
    %0 = vector.load %arg1[%c0, %c0_0] : memref<128x128xf32, #tpu.memory_space<vmem>>, vector<128x128xf32>
    %c0_1 = arith.constant 0 : index
    %c0_2 = arith.constant 0 : index
    %1 = vector.load %arg2[%c0_1, %c0_2] : memref<64x128xf32, #tpu.memory_space<vmem>>, vector<64x128xf32>
    %c0_3 = arith.constant 0 : index
    %c0_4 = arith.constant 0 : index
    %2 = vector.load %arg3[%c0_3, %c0_4] : memref<16x128xf32, #tpu.memory_space<vmem>>, vector<16x128xf32>
    %c0_5 = arith.constant 0 : index
    %c0_6 = arith.constant 0 : index
    %3 = vector.load %arg4[%c0_5, %c0_6] : memref<4x128xf32, #tpu.memory_space<vmem>>, vector<4x128xf32>
    %cst = arith.constant dense<0.000000e+00> : vector<128x64xf32>
    %4 = tpu.matmul %0, %1, %cst {dimension_numbers = #tpu.dot_dimension_numbers<[1], [1], [0], [0], [0, 0, 1, 0], [], []>} : vector<128x128xf32>, vector<64x128xf32>, vector<128x64xf32> -> vector<128x64xf32>
    %cst_7 = arith.constant dense<0xFF800000> : vector<128xf32>
    %5 = vector.multi_reduction <maximumf>, %4, %cst_7 [1] : vector<128x64xf32> to vector<128xf32>
    %6 = vector.shape_cast %5 : vector<128xf32> to vector<128x1xf32>
    %7 = vector.broadcast %6 : vector<128x1xf32> to vector<128x64xf32>
    %8 = arith.subf %4, %7 : vector<128x64xf32>
    %9 = math.exp %8 : vector<128x64xf32>
    %cst_8 = arith.constant dense<0.000000e+00> : vector<128xf32>
    %10 = vector.multi_reduction <add>, %9, %cst_8 [1] : vector<128x64xf32> to vector<128xf32>
    %11 = vector.shape_cast %10 : vector<128xf32> to vector<128x1xf32>
    %cst_9 = arith.constant 2.500000e-03 : f32
    %12 = vector.broadcast %cst_9 : f32 to vector<128x1xf32>
    %13 = arith.mulf %12, %11 : vector<128x1xf32>
    %14 = vector.broadcast %13 : vector<128x1xf32> to vector<128x64xf32>
    %15 = arith.cmpf ogt, %9, %14 : vector<128x64xf32>
    %cst_10 = arith.constant 0.000000e+00 : f32
    %16 = vector.broadcast %cst_10 : f32 to vector<128x64xf32>
    %17 = arith.select %15, %9, %16 : vector<128x64xi1>, vector<128x64xf32>
    %cst_11 = arith.constant dense<0.000000e+00> : vector<128xf32>
    %18 = vector.multi_reduction <add>, %17, %cst_11 [1] : vector<128x64xf32> to vector<128xf32>
    %19 = vector.shape_cast %18 : vector<128xf32> to vector<128x1xf32>
    %cst_12 = arith.constant 9.99999996E-13 : f32
    %20 = vector.broadcast %cst_12 : f32 to vector<128x1xf32>
    %21 = arith.maximumf %19, %20 : vector<128x1xf32>
    %cst_13 = arith.constant 1.000000e+00 : f32
    %22 = vector.broadcast %cst_13 : f32 to vector<128x1xf32>
    %23 = arith.divf %22, %21 : vector<128x1xf32>
    %24 = vector.broadcast %23 : vector<128x1xf32> to vector<128x64xf32>
    %25 = arith.mulf %17, %24 : vector<128x64xf32>
    %cst_14 = arith.constant dense<0.000000e+00> : vector<128x128xf32>
    %26 = tpu.matmul %25, %1, %cst_14 {dimension_numbers = #tpu.dot_dimension_numbers<[1], [0], [0], [1], [0, 0, 1, 1], [], []>} : vector<128x64xf32>, vector<64x128xf32>, vector<128x128xf32> -> vector<128x128xf32>
    %cst_15 = arith.constant dense<0.000000e+00> : vector<128x16xf32>
    %27 = tpu.matmul %26, %2, %cst_15 {dimension_numbers = #tpu.dot_dimension_numbers<[1], [1], [0], [0], [0, 0, 1, 0], [], []>} : vector<128x128xf32>, vector<16x128xf32>, vector<128x16xf32> -> vector<128x16xf32>
    %cst_16 = arith.constant dense<0xFF800000> : vector<128xf32>
    %28 = vector.multi_reduction <maximumf>, %27, %cst_16 [1] : vector<128x16xf32> to vector<128xf32>
    %29 = vector.shape_cast %28 : vector<128xf32> to vector<128x1xf32>
    %30 = vector.broadcast %29 : vector<128x1xf32> to vector<128x16xf32>
    %31 = arith.subf %27, %30 : vector<128x16xf32>
    %32 = math.exp %31 : vector<128x16xf32>
    %cst_17 = arith.constant dense<0.000000e+00> : vector<128xf32>
    %33 = vector.multi_reduction <add>, %32, %cst_17 [1] : vector<128x16xf32> to vector<128xf32>
    %34 = vector.shape_cast %33 : vector<128xf32> to vector<128x1xf32>
    %cst_18 = arith.constant 2.500000e-03 : f32
    %35 = vector.broadcast %cst_18 : f32 to vector<128x1xf32>
    %36 = arith.mulf %35, %34 : vector<128x1xf32>
    %37 = vector.broadcast %36 : vector<128x1xf32> to vector<128x16xf32>
    %38 = arith.cmpf ogt, %32, %37 : vector<128x16xf32>
    %cst_19 = arith.constant 0.000000e+00 : f32
    %39 = vector.broadcast %cst_19 : f32 to vector<128x16xf32>
    %40 = arith.select %38, %32, %39 : vector<128x16xi1>, vector<128x16xf32>
    %cst_20 = arith.constant dense<0.000000e+00> : vector<128xf32>
    %41 = vector.multi_reduction <add>, %40, %cst_20 [1] : vector<128x16xf32> to vector<128xf32>
    %42 = vector.shape_cast %41 : vector<128xf32> to vector<128x1xf32>
    %cst_21 = arith.constant 9.99999996E-13 : f32
    %43 = vector.broadcast %cst_21 : f32 to vector<128x1xf32>
    %44 = arith.maximumf %42, %43 : vector<128x1xf32>
    %cst_22 = arith.constant 1.000000e+00 : f32
    %45 = vector.broadcast %cst_22 : f32 to vector<128x1xf32>
    %46 = arith.divf %45, %44 : vector<128x1xf32>
    %47 = vector.broadcast %46 : vector<128x1xf32> to vector<128x16xf32>
    %48 = arith.mulf %40, %47 : vector<128x16xf32>
    %cst_23 = arith.constant dense<0.000000e+00> : vector<128x128xf32>
    %49 = tpu.matmul %48, %2, %cst_23 {dimension_numbers = #tpu.dot_dimension_numbers<[1], [0], [0], [1], [0, 0, 1, 1], [], []>} : vector<128x16xf32>, vector<16x128xf32>, vector<128x128xf32> -> vector<128x128xf32>
    %cst_24 = arith.constant dense<0.000000e+00> : vector<128x4xf32>
    %50 = tpu.matmul %49, %3, %cst_24 {dimension_numbers = #tpu.dot_dimension_numbers<[1], [1], [0], [0], [0, 0, 1, 0], [], []>} : vector<128x128xf32>, vector<4x128xf32>, vector<128x4xf32> -> vector<128x4xf32>
    %cst_25 = arith.constant dense<0xFF800000> : vector<128xf32>
    %51 = vector.multi_reduction <maximumf>, %50, %cst_25 [1] : vector<128x4xf32> to vector<128xf32>
    %52 = vector.shape_cast %51 : vector<128xf32> to vector<128x1xf32>
    %53 = vector.broadcast %52 : vector<128x1xf32> to vector<128x4xf32>
    %54 = arith.subf %50, %53 : vector<128x4xf32>
    %55 = math.exp %54 : vector<128x4xf32>
    %cst_26 = arith.constant dense<0.000000e+00> : vector<128xf32>
    %56 = vector.multi_reduction <add>, %55, %cst_26 [1] : vector<128x4xf32> to vector<128xf32>
    %57 = vector.shape_cast %56 : vector<128xf32> to vector<128x1xf32>
    %cst_27 = arith.constant 2.500000e-03 : f32
    %58 = vector.broadcast %cst_27 : f32 to vector<128x1xf32>
    %59 = arith.mulf %58, %57 : vector<128x1xf32>
    %60 = vector.broadcast %59 : vector<128x1xf32> to vector<128x4xf32>
    %61 = arith.cmpf ogt, %55, %60 : vector<128x4xf32>
    %cst_28 = arith.constant 0.000000e+00 : f32
    %62 = vector.broadcast %cst_28 : f32 to vector<128x4xf32>
    %63 = arith.select %61, %55, %62 : vector<128x4xi1>, vector<128x4xf32>
    %cst_29 = arith.constant dense<0.000000e+00> : vector<128xf32>
    %64 = vector.multi_reduction <add>, %63, %cst_29 [1] : vector<128x4xf32> to vector<128xf32>
    %65 = vector.shape_cast %64 : vector<128xf32> to vector<128x1xf32>
    %cst_30 = arith.constant 9.99999996E-13 : f32
    %66 = vector.broadcast %cst_30 : f32 to vector<128x1xf32>
    %67 = arith.maximumf %65, %66 : vector<128x1xf32>
    %cst_31 = arith.constant 1.000000e+00 : f32
    %68 = vector.broadcast %cst_31 : f32 to vector<128x1xf32>
    %69 = arith.divf %68, %67 : vector<128x1xf32>
    %70 = vector.broadcast %69 : vector<128x1xf32> to vector<128x4xf32>
    %71 = arith.mulf %63, %70 : vector<128x4xf32>
    %cst_32 = arith.constant dense<0.000000e+00> : vector<128x128xf32>
    %72 = tpu.matmul %71, %3, %cst_32 {dimension_numbers = #tpu.dot_dimension_numbers<[1], [0], [0], [1], [0, 0, 1, 1], [], []>} : vector<128x4xf32>, vector<4x128xf32>, vector<128x128xf32> -> vector<128x128xf32>
    %c0_33 = arith.constant 0 : index
    %c0_34 = arith.constant 0 : index
    %73 = vector.load %arg5[%c0_33, %c0_34] : memref<128x128xf32, #tpu.memory_space<vmem>>, vector<128x128xf32>
    tpu.vector_store %arg5[%c0_33, %c0_34], %72 {strides = array<i32>} : memref<128x128xf32, #tpu.memory_space<vmem>>, vector<128x128xf32>,
    %c0_35 = arith.constant 0 : index
    %c0_36 = arith.constant 0 : index
    %74 = vector.load %arg6[%c0_35, %c0_36] : memref<128x128xf32, #tpu.memory_space<vmem>>, vector<128x128xf32>
    tpu.vector_store %arg6[%c0_35, %c0_36], %26 {strides = array<i32>} : memref<128x128xf32, #tpu.memory_space<vmem>>, vector<128x128xf32>,
    %c0_37 = arith.constant 0 : index
    %c0_38 = arith.constant 0 : index
    %75 = vector.load %arg7[%c0_37, %c0_38] : memref<128x128xf32, #tpu.memory_space<vmem>>, vector<128x128xf32>
    tpu.vector_store %arg7[%c0_37, %c0_38], %49 {strides = array<i32>} : memref<128x128xf32, #tpu.memory_space<vmem>>, vector<128x128xf32>,
    return
  }
  func.func @transform_0(%arg0: i32) -> (i32, i32) {
    %c0_i32 = arith.constant 0 : i32
    %c0_i32_0 = arith.constant 0 : i32
    return %arg0, %c0_i32 : i32, i32
  }
  func.func @transform_1(%arg0: i32) -> (i32, i32) {
    %c0_i32 = arith.constant 0 : i32
    %c0_i32_0 = arith.constant 0 : i32
    %c0_i32_1 = arith.constant 0 : i32
    return %c0_i32, %c0_i32_0 : i32, i32
  }
  func.func @transform_2(%arg0: i32) -> (i32, i32) {
    %c0_i32 = arith.constant 0 : i32
    %c0_i32_0 = arith.constant 0 : i32
    %c0_i32_1 = arith.constant 0 : i32
    return %c0_i32, %c0_i32_0 : i32, i32
  }
  func.func @transform_3(%arg0: i32) -> (i32, i32) {
    %c0_i32 = arith.constant 0 : i32
    %c0_i32_0 = arith.constant 0 : i32
    %c0_i32_1 = arith.constant 0 : i32
    return %c0_i32, %c0_i32_0 : i32, i32
  }
  func.func @transform_4(%arg0: i32) -> (i32, i32) {
    %c0_i32 = arith.constant 0 : i32
    %c0_i32_0 = arith.constant 0 : i32
    return %arg0, %c0_i32 : i32, i32
  }
  func.func @transform_5(%arg0: i32) -> (i32, i32) {
    %c0_i32 = arith.constant 0 : i32
    %c0_i32_0 = arith.constant 0 : i32
    return %arg0, %c0_i32 : i32, i32
  }
  func.func @transform_6(%arg0: i32) -> (i32, i32) {
    %c0_i32 = arith.constant 0 : i32
    %c0_i32_0 = arith.constant 0 : i32
    return %arg0, %c0_i32 : i32, i32
  }
}

</mosaic_0001>

<bundles_post_ra>
// kernel: tpu_custom_call.1
= control target key start
LH: loop header
LB: loop body
LE: loop exit
PB: predicated region body
PF: predicated region fallthrough
CT: control target
= control target key end

     0   :  { %12 = vsyncpa [#allocation3], 0  ;;  %s4636_s0 = inlined_call_operand.hbm [shape: f32[512,128], index: 0, kind: input, shape index: {}]   ;;  %s4637_s1 = inlined_call_operand.hbm [shape: f32[64,128], index: 1, kind: input, shape index: {}]   ;;  %s4638_s2 = inlined_call_operand.hbm [shape: f32[16,128], index: 2, kind: input, shape index: {}]   ;;  %s4639_s3 = inlined_call_operand.vmem [shape: f32[4,128], index: 3, kind: input, shape index: {}]   ;;  %s4640_s4 = inlined_call_operand.hbm [shape: f32[512,128], index: 4, kind: output, shape index: {0}]   ;;  %s4641_s5 = inlined_call_operand.hbm [shape: f32[512,128], index: 5, kind: output, shape index: {1}]   ;;  %s4642_s6 = inlined_call_operand.hbm [shape: f32[512,128], index: 6, kind: output, shape index: {2}]  }
   0x1   :  { %14 = vsyncpa [#allocation3 + $0x1], 0 }
   0x2   :  { %15 = vsyncpa [#allocation6], 0 }
   0x3   :  { %16 = vsyncpa [#allocation4], 0 }
   0x4   :  { %18 = vsyncpa [#allocation4 + $0x1], 0 }
   0x5   :  { %19 = vsyncpa [#allocation10], 0 }
   0x6   :  { %21 = vsyncpa [#allocation10 + $0x1], 0  ;;  %s3501_s21 = smov 0   ;;  %s3503_s22 = smov 0  }
   0x7   :  { %s3505_s23 = smov 0   ;;  %s3507_s24 = smov 0  }
   0x8 LB: > { %s3522_s25 = sadd.s32 4294967295, %s3454_s24   ;;  %s4646_s26 = sadd.s32 4294967294, %s3454_s24   ;;  %s3454_s24 = sphi %s3507_s24, %s4663_s24   ;;  %s3450_s23 = sphi %s3505_s23, %s4662_s23   ;;  %s3446_s22 = sphi %s3503_s22, %s4661_s22   ;;  %s3442_s21 = sphi %s3501_s21, %s4660_s21  }
   0x9   : > { %p47_p0 = scmp.ne.s32.totalorder %s3446_s22, %s3442_s21  ;;  %p4643_p1 = scmp.eq.s32.totalorder %s3522_s25, 0 }
   0xa   : > { %p140_p3 = scmp.eq.s32.totalorder %s4646_s26, 3  ;;  %p2539_p5 = scmp.ge.s32.totalorder %s3454_s24, 1 }
   0xb   : > { %p3533_p4 = por %p4643_p1, %p47_p0  ;;  %p199_p7 = scmp.lt.s32.totalorder %s3454_s24, 5 }
   0xc   : > { %p3538_p6 = por %p140_p3, %p47_p0  ;;  %s3456_s30 = smov [#allocation5]  }
   0xd   : > { %s4647_s27 = scalar_select %p3533_p4, 1, 0 }
   0xe   : > { %s4648_s28 = scalar_select %p3538_p6, 1, 0 }
   0xf   : > { %p3543_p8 = pnand %p2539_p5, %p199_p7  ;;  %s211_s7 = sshll.u32 %s3456_s30, 4  ;;  %s212_s7 = int_to_ptr.vmem [resolvable:$true] %s211_s7 }
  0x10   : > { %s3457_s9 = smov [#allocation7]   ;;  %s3238_s13 = scalar_lea.hbm %s4637_s1, 1024 }
  0x11   : > { %s4649_s29 = scalar_select %p3543_p8, 1, 0 }
  0x12   : > { %p2981_p9 = pneg %p3543_p8  ;;  %s224_s10 = sshll.u32 %s3457_s9, 4  ;;  %s3555_s10 = int_to_ptr.vmem [resolvable:$true] %s224_s10 }
  0x13   : > { %p3239_p11 = scmp.ne.s32.totalorder %s4637_s1, %s3238_s13  ;;  %p3245_p3 = scmp.lt.u32.totalorder %s3238_s13, %s4637_s1 }
  0x14   : > { %p3551_p10 = pnand %p2981_p9, %p4643_p1 }
  0x16   : > { %p3240_p12 = pneg %p3551_p10 }
  0x18   : > { %p3241_p13 = pnand %p3240_p12, %p3239_p11 }
  0x1a   : > { %p3242_p0 = pneg %p3241_p13 }
  0x1c   : > { %p3247_p5 = pnand %p3245_p3, %p3242_p0 }
  0x1e   : > { %3250 = shalt.err (!%p3247_p5)
}
  0x1f   : > { %s3251_s18 = scalar_lea.vmem %s212_s7, 1024  ;;  %p3259_p2 = scmp.lt.s32.totalorder %s212_s7, %s212_s7 }
  0x20   : > { %p3252_p7 = scmp.ne.s32.totalorder %s212_s7, %s3251_s18  ;;  %p3260_p6 = scmp.lt.s32.totalorder %s3251_s18, %s3251_s18 }
  0x22   : > { %p3254_p9 = pnand %p3252_p7, %p3240_p12  ;;  %p3261_p4 = por %p3260_p6, %p3259_p2 }
  0x24   : > { %p3255_p1 = pneg %p3254_p9 }
  0x26   : > { %p3262_p8 = pnand %p3261_p4, %p3255_p1 }
  0x28   : > { %3265 = shalt.err (!%p3262_p8)
}
  0x29   : > { %s3458_s19 = smov 128   ;;  %s3459_s20 = smov 8  }
  0x2a   : > { %2984 = dma.hbm_to_vmem [thread:$0]  (!%p3551_p10), %s4637_s1, 1024, %s212_s7, [#allocation6], %s3458_s19, %s3458_s19, %s3459_s20  }
  0x2b   : > { %s3266_s13 = scalar_lea.hbm %s4638_s2, 256 }
  0x2c   : > { %p3267_p1 = scmp.ne.s32.totalorder %s4638_s2, %s3266_s13  ;;  %p3273_p6 = scmp.lt.u32.totalorder %s3266_s13, %s4638_s2 }
  0x2e   : > { %p3269_p2 = pnand %p3267_p1, %p3240_p12 }
  0x30   : > { %p3270_p4 = pneg %p3269_p2 }
  0x32   : > { %p3275_p8 = pnand %p3273_p6, %p3270_p4 }
  0x34   : > { %3278 = shalt.err (!%p3275_p8)
}
  0x35   : > { %s3279_s7 = scalar_lea.vmem %s3555_s10, 256  ;;  %p3287_p3 = scmp.lt.s32.totalorder %s3555_s10, %s3555_s10 }
  0x36   : > { %p3280_p11 = scmp.ne.s32.totalorder %s3555_s10, %s3279_s7  ;;  %p3288_p5 = scmp.lt.s32.totalorder %s3279_s7, %s3279_s7 }
  0x38   : > { %p3282_p13 = pnand %p3280_p11, %p3240_p12  ;;  %p3289_p7 = por %p3288_p5, %p3287_p3 }
  0x3a   : > { %p3283_p0 = pneg %p3282_p13 }
  0x3c   : > { %p3290_p9 = pnand %p3289_p7, %p3283_p0 }
  0x3e   : > { %3293 = shalt.err (!%p3290_p9)
}
  0x3f   : > { %2987 = dma.hbm_to_vmem [thread:$0]  (!%p3551_p10), %s4638_s2, 256, %s3555_s10, [#allocation6], %s3458_s19, %s3458_s19, %s3459_s20  }
  0x40   : > { %s3611_s8 = sadd.s32 1, %s3454_s24   ;;  %s34_s9 = sadd.s32 1, %s3450_s23 }
  0x41   : > { %s31_s11 = ssub.s32 %s3454_s24, %s3611_s8  ;;  %p41_p12 = scmp.ne.s32.totalorder %s3450_s23, %s3446_s22 }
  0x42   : > { %p32_p1 = scmp.eq.s32.totalorder %s31_s11, 0  ;;  %p42_p2 = scmp.eq.s32.totalorder %s3454_s24, 0 }
  0x43   : > { %p4651_p4 = scmp.eq.s32.totalorder %s3522_s25, 3  ;;  %p3004_p8 = scmp.lt.s32.totalorder %s3454_s24, 4 }
  0x44   : > { %s3627_s13 = scalar_select %p32_p1, %s3450_s23, %s34_s9  }
  0x45   : > { %p3621_p6 = por %p4651_p4, %p41_p12  ;;  %p43_p11 = por %p42_p2, %p41_p12 }
  0x46   : > { %s241_s14 = sand.u32 1, %s3450_s23   ;;  %s2613_s10 = sshll.u32 %s3454_s24, 11 }
  0x47   : > { %s2543_s15 = sshll.u32 %s241_s14, 7  ;;  %s3634_s7 = scalar_lea.hbm %s4636_s0, %s2613_s10 }
  0x48   : > { %s245_s18 = scalar_lea.vmem [#allocation2], %s2543_s15  ;;  %p3638_p10 = pnand %p3004_p8, %p43_p11 }
  0x49   : > { %s252_s30 = sshll.u32 %s245_s18, 4  ;;  %s3642_s11 = scalar_lea.sflag [#allocation3], %s241_s14  ;;  %s3636_s30 = int_to_ptr.vmem [resolvable:$true] %s252_s30 }
  0x4a   : > { %s3294_s26 = scalar_lea.hbm %s3634_s7, 2048  ;;  %p3296_p0 = pneg %p3638_p10 }
  0x4b   : > { %p3295_p13 = scmp.ne.s32.totalorder %s3634_s7, %s3294_s26  ;;  %s3299_s16 = scalar_lea.hbm %s4636_s0, 8192 }
  0x4c   : > { %p3300_p7 = scmp.lt.u32.totalorder %s3634_s7, %s4636_s0  ;;  %p3301_p9 = scmp.lt.u32.totalorder %s3299_s16, %s3294_s26 }
  0x4d   : > { %p3297_p3 = pnand %p3296_p0, %p3295_p13  ;;  %p3303_p1 = scmp.lt.u32.totalorder %s3294_s26, %s3634_s7 }
  0x4e   : > { %p3302_p12 = por %p3301_p9, %p3300_p7 }
  0x4f   : > { %p3298_p5 = pneg %p3297_p3 }
  0x50   : > { %p3304_p2 = por %p3303_p1, %p3302_p12 }
  0x52   : > { %p3305_p4 = pnand %p3304_p2, %p3298_p5 }
  0x54   : > { %3308 = shalt.err (!%p3305_p4)
}
  0x55   : > { %s3309_s14 = scalar_lea.vmem %s3636_s30, 2048  ;;  %s3460_s15 = smov [#allocation2]  }
  0x56   : > { %p3310_p8 = scmp.ne.s32.totalorder %s3636_s30, %s3309_s14  ;;  %s3314_s10 = sshll.u32 %s3460_s15, 4  ;;  %s3315_s10 = int_to_ptr.vmem [resolvable:$false] %s3314_s10 }
  0x57   : > { %s3316_s17 = scalar_lea.vmem %s3315_s10, 4096  ;;  %p3317_p3 = scmp.lt.s32.totalorder %s3636_s30, %s3315_s10 }
  0x58   : > { %p3312_p11 = pnand %p3310_p8, %p3296_p0  ;;  %p3318_p7 = scmp.lt.s32.totalorder %s3316_s17, %s3309_s14 }
  0x5a   : > { %p3313_p13 = pneg %p3312_p11  ;;  %p3319_p9 = por %p3318_p7, %p3317_p3 }
  0x5c   : > { %p3320_p12 = pnand %p3319_p9, %p3313_p13 }
  0x5e   : > { %3323 = shalt.err (!%p3320_p12)
}
  0x5f   : > { %2991 = dma.hbm_to_vmem [thread:$0]  (!%p3638_p10), %s3634_s7, 2048, %s3636_s30, %s3642_s11, %s3458_s19, %s3458_s19, %s3459_s20  }
  0x60   : > { %p4654_p0 = scmp.ne.s32.totalorder %s4649_s29, 0 }
  0x61   : > { %s3676_s26 = sand.u32 (!%p4654_p0), 1, %s3446_s22   ;;  %p4655_p5 = scmp.ne.s32.totalorder (!%p4654_p0), %s4647_s27, 0 }
  0x62   : > { %264 = sbr.rel (%p4654_p0) target bundleno = 2861 (0xb2d), region = 36  ;;  %s3679_s16 = sshll.u32 (!%p4654_p0), %s3676_s26, 7 }
  0x63   : > { %s267_s9 = scalar_lea.sflag (!%p4654_p0), [#allocation3], %s3676_s26  ;;  %s3683_s18 = scalar_lea.vmem (!%p4654_p0), [#allocation2], %s3679_s16 }
  0x69   : > { %3425 = dma.done.wait (%p4655_p5), %s267_s9, 2048  }
  0x6a   : > { %3427 = vsyncadd (%p4655_p5), %s267_s9, 4294965248  ;;  %p4656_p10 = scmp.eq.s32.totalorder %s3522_s25, 0 }
  0x6c   : > { %3429 = dma.done.wait (%p4656_p10), [#allocation6], 1280   ;;  %p4657_p1 = pmov %p4656_p10 }
  0x6d   : > { %v337_v0 = vld [vmem:[#allocation5] sm:$0xff]  ;;  %v338_v1 = vld [vmem:[#allocation5 + $0x8] sm:$0xff]  ;;  %v339_v2 = vld [vmem:[#allocation5 + $0x10] sm:$0xff]  ;;  %vm493_vm0 = vcmask 523264   ;;  %s3961_s27 = scalar_lea.vmem [#allocation9], %s3679_s16  ;;  %s4228_s20 = scalar_lea.vmem [#allocation11], %s3679_s16 }
  0x6e   : > { %3431 = vsyncadd (%p4657_p1), [#allocation6], 4294966016  ;;  %v2923_v3 = vpack.c.bf16 %v338_v1, %v337_v0  ;;  %v340_v4 = vld [vmem:[#allocation5 + $0x18] sm:$0xff]  ;;  %v321_v6 = vld [vmem:[%s3683_s18] sm:$0xff]  ;;  %s2334_s7 = sand.u32 1, %s3522_s25   ;;  %s4490_s30 = sshll.u32 %s3522_s25, 11 }
  0x6f   : > { %v2927_v5 = vpack.c.bf16 %v340_v4, %v339_v2  ;;  %2751 = vmatprep.mubr.f32.mxu0 %v321_v6  ;;  %v341_v7 = vld [vmem:[#allocation5 + $0x20] sm:$0xff]  ;;  %v342_v8 = vld [vmem:[#allocation5 + $0x28] sm:$0xff]  ;;  %v343_v10 = vld [vmem:[#allocation5 + $0x30] sm:$0xff]  ;;  %s4496_s15 = scalar_lea.hbm %s4641_s5, %s4490_s30  ;;  %s2369_s10 = sshll.u32 %s3961_s27, 4  ;;  %s4499_s10 = int_to_ptr.vmem [resolvable:$true] %s2369_s10 }
  0x70   : > { %2924 = vmatprep.subr.bf16.mxu0 %v2923_v3  ;;  %2940 = vmatprep.subr.bf16.mxu1 %v2923_v3  ;;  %v2931_v9 = vpack.c.bf16 %v342_v8, %v341_v7  ;;  %v344_v11 = vld [vmem:[#allocation5 + $0x38] sm:$0xff]  ;;  %v322_v13 = vld [vmem:[%s3683_s18 + $0x8] sm:$0xff]  ;;  %v323_v14 = vld [vmem:[%s3683_s18 + $0x10] sm:$0xff]  ;;  %s4501_s17 = scalar_lea.sflag [#allocation10], %s2334_s7  ;;  %s3324_s9 = scalar_lea.vmem %s4499_s10, 2048 }
  0x71   : > { %2926 = vmatpush3.bf16.xpose.msra.mxu0 %v2923_v3  ;;  %2942 = vmatpush3.bf16.msra.mxu1 %v2923_v3  ;;  %v2935_v12 = vpack.c.bf16 %v344_v11, %v343_v10  ;;  %v324_v15 = vld [vmem:[%s3683_s18 + $0x18] sm:$0xff]  ;;  %v325_v16 = vld [vmem:[%s3683_s18 + $0x20] sm:$0xff]  ;;  %v326_v17 = vld [vmem:[%s3683_s18 + $0x28] sm:$0xff]  ;;  %p3325_p2 = scmp.ne.s32.totalorder %s4499_s10, %s3324_s9  ;;  %s3461_s25 = smov [#allocation9]  }
  0x72   : > { %2928 = vmatprep.subr.bf16.mxu0 %v2927_v5  ;;  %2944 = vmatprep.subr.bf16.mxu1 %v2927_v5  ;;  %v327_v18 = vld [vmem:[%s3683_s18 + $0x30] sm:$0xff]  ;;  %v328_v19 = vld [vmem:[%s3683_s18 + $0x38] sm:$0xff]  ;;  %v329_v20 = vld [vmem:[%s3683_s18 + $0x40] sm:$0xff] }
  0x73   : > { %v330_v21 = vld [vmem:[%s3683_s18 + $0x48] sm:$0xff]  ;;  %v331_v22 = vld [vmem:[%s3683_s18 + $0x50] sm:$0xff]  ;;  %v332_v23 = vld [vmem:[%s3683_s18 + $0x58] sm:$0xff]  ;;  %p3326_p4 = pnand %p3325_p2, %p3621_p6 }
  0x74   : > { %v333_v24 = vld [vmem:[%s3683_s18 + $0x60] sm:$0xff]  ;;  %v334_v25 = vld [vmem:[%s3683_s18 + $0x68] sm:$0xff]  ;;  %v335_v26 = vld [vmem:[%s3683_s18 + $0x70] sm:$0xff] }
  0x75   : > { %2946 = vmatpush3.bf16.msra.mxu1 %v2927_v5  ;;  %v336_v27 = vld [vmem:[%s3683_s18 + $0x78] sm:$0xff]  ;;  %p3327_p8 = pneg %p3326_p4  ;;  %s3328_s18 = sshll.u32 %s3461_s25, 4  ;;  %s3329_s18 = int_to_ptr.vmem [resolvable:$false] %s3328_s18 }
  0x76   : > { %2948 = vmatprep.subr.bf16.mxu1 %v2931_v9  ;;  %s3330_s29 = scalar_lea.vmem %s3329_s18, 4096  ;;  %p3331_p11 = scmp.lt.s32.totalorder %s4499_s10, %s3329_s18 }
  0x77   : > { %p3332_p13 = scmp.lt.s32.totalorder %s3330_s29, %s3324_s9 }
  0x79   : > { %2930 = vmatpush3.bf16.xpose.msra.mxu0 %v2927_v5  ;;  %2950 = vmatpush3.bf16.msra.mxu1 %v2931_v9  ;;  %p3333_p3 = por %p3332_p13, %p3331_p11 }
  0x7a   : > { %2932 = vmatprep.subr.bf16.mxu0 %v2931_v9  ;;  %2952 = vmatprep.subr.bf16.mxu1 %v2935_v12 }
  0x7b   : > { %p3334_p7 = pnand %p3333_p3, %p3327_p8 }
  0x7d   : > { %2954 = vmatpush3.bf16.msra.mxu1 %v2935_v12 }
  0x81   : > { %2934 = vmatpush3.bf16.xpose.msra.mxu0 %v2931_v9 }
  0x82   : > { %2936 = vmatprep.subr.bf16.mxu0 %v2935_v12 }
  0x89   : > { %2938 = vmatpush3.bf16.xpose.msra.mxu0 %v2935_v12 }
  0x90   : > { %2752 = vmatmul.mubr.f32.vlgmr.msra.gmra.mrb[0].mxu0 %v322_v13 }
  0x91   : > { %2754 = vmatprep.mubr.f32.mxu0 %v323_v14 }
  0x94   : > { %2755 = vmatmul.mubr.f32.gmra.mrb[2].mxu0 %v324_v15 }
  0x95   : > { %2757 = vmatprep.mubr.f32.mxu0 %v325_v16 }
  0x98   : > { %2758 = vmatmul.mubr.f32.gmra.mrb[4].mxu0 %v326_v17 }
  0x99   : > { %2760 = vmatprep.mubr.f32.mxu0 %v327_v18 }
  0x9c   : > { %2761 = vmatmul.mubr.f32.gmra.mrb[6].mxu0 %v328_v19 }
  0x9d   : > { %2763 = vmatprep.mubr.f32.mxu0 %v329_v20 }
  0xa0   : > { %2764 = vmatmul.mubr.f32.gmra.mrb[8].mxu0 %v330_v21 }
  0xa1   : > { %2766 = vmatprep.mubr.f32.mxu0 %v331_v22 }
  0xa4   : > { %2767 = vmatmul.mubr.f32.gmra.mrb[10].mxu0 %v332_v23 }
  0xa5   : > { %2769 = vmatprep.mubr.f32.mxu0 %v333_v24 }
  0xa8   : > { %2770 = vmatmul.mubr.f32.gmra.mrb[12].mxu0 %v334_v25 }
  0xa9   : > { %2772 = vmatprep.mubr.f32.mxu0 %v335_v26 }
  0xac   : > { %2773 = vmatmul.mubr.f32.gmra.mrb[14].mxu0 %v336_v27 }
 0x163   : > { %v2753_v28 = vpop.f32.mrb[0].mxu0 }
 0x164   : > { %v414_v29 = vpop.f32.mrb[1].mxu0  ;;  %v497_v33 = vsel %vm493_vm0, %v2753_v28, -inf }
 0x165   : > { %v494_v30 = vsel %vm493_vm0, %v414_v29, -inf }
 0x166   : > { %495 = vmax.xlane.f32.xlu0 %v494_v30 }
 0x167   : > { %v2756_v31 = vpop.f32.mrb[2].mxu0 }
 0x168   : > { %v424_v32 = vpop.f32.mrb[3].mxu0  ;;  %v503_v37 = vsel %vm493_vm0, %v2756_v31, -inf }
 0x169   : > { %v500_v34 = vsel %vm493_vm0, %v424_v32, -inf }
 0x16a   : > { %498 = vmax.xlane.f32.xlu0 %v497_v33  ;;  %501 = vmax.xlane.f32.xlu1 %v500_v34 }
 0x16b   : > { %v3712_v35 = vpop.f32.mrb[4].mxu0 }
 0x16c   : > { %v434_v36 = vpop.f32.mrb[5].mxu0  ;;  %v509_v41 = vsel %vm493_vm0, %v3712_v35, -inf }
 0x16d   : > { %v506_v38 = vsel %vm493_vm0, %v434_v36, -inf }
 0x16e   : > { %504 = vmax.xlane.f32.xlu1 %v503_v37  ;;  %507 = vmax.xlane.f32.xlu0 %v506_v38 }
 0x16f   : > { %v3716_v39 = vpop.f32.mrb[6].mxu0 }
 0x170   : > { %v444_v40 = vpop.f32.mrb[7].mxu0  ;;  %v515_v45 = vsel %vm493_vm0, %v3716_v39, -inf }
 0x171   : > { %v512_v42 = vsel %vm493_vm0, %v444_v40, -inf }
 0x172   : > { %510 = vmax.xlane.f32.xlu1 %v509_v41  ;;  %513 = vmax.xlane.f32.xlu0 %v512_v42 }
 0x173   : > { %v3721_v43 = vpop.f32.mrb[8].mxu0 }
 0x174   : > { %v454_v44 = vpop.f32.mrb[9].mxu0  ;;  %v521_v49 = vsel %vm493_vm0, %v3721_v43, -inf }
 0x175   : > { %v518_v46 = vsel %vm493_vm0, %v454_v44, -inf }
 0x176   : > { %516 = vmax.xlane.f32.xlu1 %v515_v45  ;;  %519 = vmax.xlane.f32.xlu0 %v518_v46 }
 0x177   : > { %v3726_v47 = vpop.f32.mrb[10].mxu0 }
 0x178   : > { %v3728_v48 = vpop.f32.mrb[11].mxu0  ;;  %v527_v53 = vsel %vm493_vm0, %v3726_v47, -inf }
 0x179   : > { %v524_v50 = vsel %vm493_vm0, %v3728_v48, -inf }
 0x17a   : > { %522 = vmax.xlane.f32.xlu1 %v521_v49  ;;  %525 = vmax.xlane.f32.xlu0 %v524_v50 }
 0x17b   : > { %v3734_v51 = vpop.f32.mrb[12].mxu0 }
 0x17c   : > { %v3736_v52 = vpop.f32.mrb[13].mxu0  ;;  %v533_v57 = vsel %vm493_vm0, %v3734_v51, -inf }
 0x17d   : > { %v530_v54 = vsel %vm493_vm0, %v3736_v52, -inf }
 0x17e   : > { %528 = vmax.xlane.f32.xlu1 %v527_v53  ;;  %531 = vmax.xlane.f32.xlu0 %v530_v54 }
 0x17f   : > { %v3742_v55 = vpop.f32.mrb[14].mxu0 }
 0x180   : > { %v3744_v56 = vpop.f32.mrb[15].mxu0  ;;  %v539_v59 = vsel %vm493_vm0, %v3742_v55, -inf }
 0x181   : > { %v536_v58 = vsel %vm493_vm0, %v3744_v56, -inf }
 0x182   : > { %534 = vmax.xlane.f32.xlu1 %v533_v57  ;;  %537 = vmax.xlane.f32.xlu0 %v536_v58 }
 0x186   : > { %540 = vmax.xlane.f32.xlu1 %v539_v59 }
 0x1f3   : > { %v496_v60 = vpop.xlane.xlu0 %495 }
 0x1f4   : > { %v542_v61 = vsub.f32 %v414_v29, %v496_v60 }
 0x1f6   : > { %v558_v62 = vmul.f32 1.442695, %v542_v61 }
 0x1f7   : > { %v499_v63 = vpop.xlane.xlu0 %498  ;;  %v502_v0 = vpop.xlane.xlu1 %501 }
 0x1f8   : > { %3046 = vpow2.f32 %v558_v62  ;;  %v543_v1 = vsub.f32 %v2753_v28, %v499_v63  ;;  %v544_v2 = vsub.f32 %v424_v32, %v502_v0 }
 0x1fa   : > { %v560_v3 = vmul.f32 1.442695, %v543_v1  ;;  %v562_v4 = vmul.f32 1.442695, %v544_v2 }
 0x1fb   : > { %v505_v5 = vpop.xlane.xlu1 %504  ;;  %v508_v6 = vpop.xlane.xlu0 %507 }
 0x1fc   : > { %3048 = vpow2.f32 %v560_v3  ;;  %v545_v7 = vsub.f32 %v2756_v31, %v505_v5  ;;  %v546_v8 = vsub.f32 %v434_v36, %v508_v6 }
 0x1fd   : > { %3050 = vpow2.f32 %v562_v4 }
 0x1fe   : > { %v564_v9 = vmul.f32 1.442695, %v545_v7  ;;  %v566_v10 = vmul.f32 1.442695, %v546_v8 }
 0x1ff   : > { %v511_v11 = vpop.xlane.xlu1 %510  ;;  %v514_v12 = vpop.xlane.xlu0 %513 }
 0x200   : > { %3052 = vpow2.f32 %v564_v9  ;;  %v547_v13 = vsub.f32 %v3712_v35, %v511_v11  ;;  %v548_v14 = vsub.f32 %v444_v40, %v514_v12 }
 0x201   : > { %3054 = vpow2.f32 %v566_v10 }
 0x202   : > { %v3753_v15 = vpop.eup %3046  ;;  %v568_v16 = vmul.f32 1.442695, %v547_v13  ;;  %v570_v17 = vmul.f32 1.442695, %v548_v14 }
 0x203   : > { %v517_v18 = vpop.xlane.xlu1 %516  ;;  %v520_v19 = vpop.xlane.xlu0 %519  ;;  %v590_v20 = vsel %vm493_vm0, %v3753_v15, 0.0 }
 0x204   : > { %3056 = vpow2.f32 %v568_v16  ;;  %v549_v21 = vsub.f32 %v3716_v39, %v517_v18  ;;  %v550_v22 = vsub.f32 %v454_v44, %v520_v19  ;;  %591 = vadd.xlane.f32.xlu0 %v590_v20 }
 0x205   : > { %3058 = vpow2.f32 %v570_v17 }
 0x206   : > { %v3758_v23 = vpop.eup %3048  ;;  %v572_v24 = vmul.f32 1.442695, %v549_v21  ;;  %v574_v25 = vmul.f32 1.442695, %v550_v22 }
 0x207   : > { %v3760_v26 = vpop.eup %3050  ;;  %v523_v27 = vpop.xlane.xlu1 %522  ;;  %v593_v29 = vsel %vm493_vm0, %v3758_v23, 0.0 }
 0x208   : > { %v526_v28 = vpop.xlane.xlu0 %525  ;;  %3060 = vpow2.f32 %v572_v24  ;;  %v551_v30 = vsub.f32 %v3721_v43, %v523_v27  ;;  %594 = vadd.xlane.f32.xlu1 %v593_v29  ;;  %v596_v32 = vsel %vm493_vm0, %v3760_v26, 0.0 }
 0x209   : > { %v552_v31 = vsub.f32 %v3728_v48, %v526_v28  ;;  %3062 = vpow2.f32 %v574_v25  ;;  %597 = vadd.xlane.f32.xlu0 %v596_v32 }
 0x20a   : > { %v3768_v33 = vpop.eup %3052  ;;  %v576_v34 = vmul.f32 1.442695, %v551_v30 }
 0x20b   : > { %v578_v35 = vmul.f32 1.442695, %v552_v31  ;;  %v3770_v36 = vpop.eup %3054  ;;  %v529_v37 = vpop.xlane.xlu1 %528  ;;  %v599_v39 = vsel %vm493_vm0, %v3768_v33, 0.0 }
 0x20c   : > { %v532_v38 = vpop.xlane.xlu0 %531  ;;  %3064 = vpow2.f32 %v576_v34  ;;  %v553_v40 = vsub.f32 %v3726_v47, %v529_v37  ;;  %600 = vadd.xlane.f32.xlu1 %v599_v39  ;;  %v602_v42 = vsel %vm493_vm0, %v3770_v36, 0.0 }
 0x20d   : > { %v554_v41 = vsub.f32 %v3736_v52, %v532_v38  ;;  %3066 = vpow2.f32 %v578_v35  ;;  %603 = vadd.xlane.f32.xlu0 %v602_v42 }
 0x20e   : > { %v3778_v43 = vpop.eup %3056  ;;  %v580_v44 = vmul.f32 1.442695, %v553_v40 }
 0x20f   : > { %v582_v45 = vmul.f32 1.442695, %v554_v41  ;;  %v3780_v46 = vpop.eup %3058  ;;  %v535_v48 = vpop.xlane.xlu1 %534  ;;  %v605_v50 = vsel %vm493_vm0, %v3778_v43, 0.0 }
 0x210   : > { %v538_v49 = vpop.xlane.xlu0 %537  ;;  %3068 = vpow2.f32 %v580_v44  ;;  %v555_v47 = vsub.f32 %v3734_v51, %v535_v48  ;;  %606 = vadd.xlane.f32.xlu1 %v605_v50  ;;  %v608_v53 = vsel %vm493_vm0, %v3780_v46, 0.0 }
 0x211   : > { %v556_v52 = vsub.f32 %v3744_v56, %v538_v49  ;;  %3070 = vpow2.f32 %v582_v45  ;;  %609 = vadd.xlane.f32.xlu0 %v608_v53 }
 0x212   : > { %v3788_v54 = vpop.eup %3060  ;;  %v584_v57 = vmul.f32 1.442695, %v555_v47 }
 0x213   : > { %v586_v58 = vmul.f32 1.442695, %v556_v52  ;;  %v3790_v59 = vpop.eup %3062  ;;  %v541_v60 = vpop.xlane.xlu1 %540  ;;  %v611_v61 = vsel %vm493_vm0, %v3788_v54, 0.0 }
 0x214   : > { %3072 = vpow2.f32 %v584_v57  ;;  %v557_v51 = vsub.f32 %v3742_v55, %v541_v60  ;;  %612 = vadd.xlane.f32.xlu1 %v611_v61  ;;  %v614_v56 = vsel %vm493_vm0, %v3790_v59, 0.0 }
 0x215   : > { %3074 = vpow2.f32 %v586_v58  ;;  %615 = vadd.xlane.f32.xlu0 %v614_v56 }
 0x216   : > { %v3797_v62 = vpop.eup %3064  ;;  %v588_v63 = vmul.f32 1.442695, %v557_v51 }
 0x217   : > { %v3799_v0 = vpop.eup %3066  ;;  %v617_v1 = vsel %vm493_vm0, %v3797_v62, 0.0 }
 0x218   : > { %3076 = vpow2.f32 %v588_v63  ;;  %618 = vadd.xlane.f32.xlu1 %v617_v1  ;;  %v620_v2 = vsel %vm493_vm0, %v3799_v0, 0.0 }
 0x219   : > { %621 = vadd.xlane.f32.xlu0 %v620_v2 }
 0x21a   : > { %v3805_v55 = vpop.eup %3068 }
 0x21b   : > { %v3807_v3 = vpop.eup %3070  ;;  %v623_v4 = vsel %vm493_vm0, %v3805_v55, 0.0 }
 0x21c   : > { %624 = vadd.xlane.f32.xlu1 %v623_v4  ;;  %v626_v5 = vsel %vm493_vm0, %v3807_v3, 0.0 }
 0x21d   : > { %627 = vadd.xlane.f32.xlu0 %v626_v5 }
 0x21e   : > { %v3813_v6 = vpop.eup %3072 }
 0x21f   : > { %v3815_v7 = vpop.eup %3074  ;;  %v629_v8 = vsel %vm493_vm0, %v3813_v6, 0.0 }
 0x220   : > { %630 = vadd.xlane.f32.xlu1 %v629_v8  ;;  %v632_v9 = vsel %vm493_vm0, %v3815_v7, 0.0 }
 0x221   : > { %633 = vadd.xlane.f32.xlu0 %v632_v9 }
 0x222   : > { %v3821_v10 = vpop.eup %3076 }
 0x223   : > { %v635_v11 = vsel %vm493_vm0, %v3821_v10, 0.0 }
 0x224   : > { %636 = vadd.xlane.f32.xlu1 %v635_v11 }
 0x291   : > { %v592_v12 = vpop.xlane.xlu0 %591 }
 0x292   : > { %v638_v13 = vmul.f32 0.0025, %v592_v12 }
 0x294   : > { %vm654_vm1 = vcmp.gt.f32.partialorder %v3753_v15, %v638_v13 }
 0x295   : > { %v595_v14 = vpop.xlane.xlu1 %594  ;;  %v3827_v16 = vsel %vm654_vm1, %v3753_v15, 0.0 }
 0x296   : > { %v639_v17 = vmul.f32 0.0025, %v595_v14  ;;  %v598_v18 = vpop.xlane.xlu0 %597  ;;  %v686_v19 = vsel %vm493_vm0, %v3827_v16, 0.0  ;;  %v345_v14 = vld [vmem:[#allocation7] sm:$0xff] }
 0x297   : > { %v640_v20 = vmul.f32 0.0025, %v598_v18  ;;  %687 = vadd.xlane.f32.xlu0 %v686_v19 }
 0x298   : > { %vm655_vm2 = vcmp.gt.f32.partialorder %v3758_v23, %v639_v17  ;;  %v346_v17 = vld [vmem:[#allocation7 + $0x8] sm:$0xff] }
 0x299   : > { %v601_v21 = vpop.xlane.xlu1 %600  ;;  %v3833_v22 = vsel %vm655_vm2, %v3758_v23, 0.0  ;;  %vm656_vm3 = vcmp.gt.f32.partialorder %v3760_v26, %v640_v20  ;;  %v3921_v18 = vpack.c.bf16 %v346_v17, %v345_v14 }
 0x29a   : > { %v641_v24 = vmul.f32 0.0025, %v601_v21  ;;  %v604_v25 = vpop.xlane.xlu0 %603  ;;  %v689_v15 = vsel %vm493_vm0, %v3833_v22, 0.0  ;;  %v3839_v27 = vsel %vm656_vm3, %v3760_v26, 0.0 }
 0x29b   : > { %v642_v28 = vmul.f32 0.0025, %v604_v25  ;;  %690 = vadd.xlane.f32.xlu1 %v689_v15  ;;  %v692_v29 = vsel %vm493_vm0, %v3839_v27, 0.0  ;;  %2956 = vmatprep.subr.bf16.mxu1 %v3921_v18 }
 0x29c   : > { %693 = vadd.xlane.f32.xlu0 %v692_v29  ;;  %vm657_vm4 = vcmp.gt.f32.partialorder %v3768_v33, %v641_v24  ;;  %2960 = vmatprep.subr.bf16.mxu0 %v3921_v18 }
 0x29d   : > { %v607_v23 = vpop.xlane.xlu1 %606  ;;  %v3845_v30 = vsel %vm657_vm4, %v3768_v33, 0.0  ;;  %vm658_vm5 = vcmp.gt.f32.partialorder %v3770_v36, %v642_v28  ;;  %2962 = vmatpush3.bf16.msra.mxu0 %v3921_v18 }
 0x29e   : > { %v643_v31 = vmul.f32 0.0025, %v607_v23  ;;  %v610_v32 = vpop.xlane.xlu0 %609  ;;  %v695_v26 = vsel %vm493_vm0, %v3845_v30, 0.0  ;;  %v3851_v34 = vsel %vm658_vm5, %v3770_v36, 0.0 }
 0x29f   : > { %v644_v35 = vmul.f32 0.0025, %v610_v32  ;;  %696 = vadd.xlane.f32.xlu1 %v695_v26  ;;  %v698_v37 = vsel %vm493_vm0, %v3851_v34, 0.0 }
 0x2a0   : > { %699 = vadd.xlane.f32.xlu0 %v698_v37  ;;  %vm659_vm6 = vcmp.gt.f32.partialorder %v3778_v43, %v643_v31 }
 0x2a1   : > { %v613_v33 = vpop.xlane.xlu1 %612  ;;  %v3857_v38 = vsel %vm659_vm6, %v3778_v43, 0.0  ;;  %vm660_vm7 = vcmp.gt.f32.partialorder %v3780_v46, %v644_v35 }
 0x2a2   : > { %v645_v39 = vmul.f32 0.0025, %v613_v33  ;;  %v616_v40 = vpop.xlane.xlu0 %615  ;;  %v701_v36 = vsel %vm493_vm0, %v3857_v38, 0.0  ;;  %v3863_v41 = vsel %vm660_vm7, %v3780_v46, 0.0 }
 0x2a3   : > { %v646_v42 = vmul.f32 0.0025, %v616_v40  ;;  %702 = vadd.xlane.f32.xlu1 %v701_v36  ;;  %v704_v44 = vsel %vm493_vm0, %v3863_v41, 0.0 }
 0x2a4   : > { %705 = vadd.xlane.f32.xlu0 %v704_v44  ;;  %vm661_vm8 = vcmp.gt.f32.partialorder %v3788_v54, %v645_v39 }
 0x2a5   : > { %v619_v43 = vpop.xlane.xlu1 %618  ;;  %v3869_v45 = vsel %vm661_vm8, %v3788_v54, 0.0  ;;  %vm662_vm9 = vcmp.gt.f32.partialorder %v3790_v59, %v646_v42 }
 0x2a6   : > { %v647_v48 = vmul.f32 0.0025, %v619_v43  ;;  %v622_v49 = vpop.xlane.xlu0 %621  ;;  %v707_v46 = vsel %vm493_vm0, %v3869_v45, 0.0  ;;  %v3875_v50 = vsel %vm662_vm9, %v3790_v59, 0.0 }
 0x2a7   : > { %v648_v47 = vmul.f32 0.0025, %v622_v49  ;;  %708 = vadd.xlane.f32.xlu1 %v707_v46  ;;  %v710_v52 = vsel %vm493_vm0, %v3875_v50, 0.0 }
 0x2a8   : > { %711 = vadd.xlane.f32.xlu0 %v710_v52  ;;  %vm663_vm10 = vcmp.gt.f32.partialorder %v3797_v62, %v647_v48 }
 0x2a9   : > { %v625_v53 = vpop.xlane.xlu1 %624  ;;  %v3881_v54 = vsel %vm663_vm10, %v3797_v62, 0.0  ;;  %vm664_vm11 = vcmp.gt.f32.partialorder %v3799_v0, %v648_v47 }
 0x2aa   : > { %v649_v57 = vmul.f32 0.0025, %v625_v53  ;;  %v628_v58 = vpop.xlane.xlu0 %627  ;;  %v713_v59 = vsel %vm493_vm0, %v3881_v54, 0.0  ;;  %v3887_v60 = vsel %vm664_vm11, %v3799_v0, 0.0 }
 0x2ab   : > { %v650_v61 = vmul.f32 0.0025, %v628_v58  ;;  %714 = vadd.xlane.f32.xlu1 %v713_v59  ;;  %v716_v51 = vsel %vm493_vm0, %v3887_v60, 0.0 }
 0x2ac   : > { %717 = vadd.xlane.f32.xlu0 %v716_v51  ;;  %vm665_vm12 = vcmp.gt.f32.partialorder %v3805_v55, %v649_v57 }
 0x2ad   : > { %v631_v56 = vpop.xlane.xlu1 %630  ;;  %v3893_v62 = vsel %vm665_vm12, %v3805_v55, 0.0  ;;  %vm666_vm13 = vcmp.gt.f32.partialorder %v3807_v3, %v650_v61 }
 0x2ae   : > { %v651_v63 = vmul.f32 0.0025, %v631_v56  ;;  %v634_v1 = vpop.xlane.xlu0 %633  ;;  %v719_v0 = vsel %vm493_vm0, %v3893_v62, 0.0  ;;  %v3899_v2 = vsel %vm666_vm13, %v3807_v3, 0.0 }
 0x2af   : > { %v652_v4 = vmul.f32 0.0025, %v634_v1  ;;  %720 = vadd.xlane.f32.xlu1 %v719_v0  ;;  %v722_v5 = vsel %vm493_vm0, %v3899_v2, 0.0 }
 0x2b0   : > { %723 = vadd.xlane.f32.xlu0 %v722_v5  ;;  %vm667_vm14 = vcmp.gt.f32.partialorder %v3813_v6, %v651_v63 }
 0x2b1   : > { %v637_v55 = vpop.xlane.xlu1 %636  ;;  %v3905_v8 = vsel %vm667_vm14, %v3813_v6, 0.0  ;;  %vm668_vm15 = vcmp.gt.f32.partialorder %v3815_v7, %v652_v4 }
 0x2b2   : > { %v653_v9 = vmul.f32 0.0025, %v637_v55  ;;  %v725_v11 = vsel %vm493_vm0, %v3905_v8, 0.0  ;;  %v3911_v3 = vsel %vm668_vm15, %v3815_v7, 0.0 }
 0x2b3   : > { %726 = vadd.xlane.f32.xlu1 %v725_v11  ;;  %v728_v12 = vsel %vm493_vm0, %v3911_v3, 0.0 }
 0x2b4   : > { %729 = vadd.xlane.f32.xlu0 %v728_v12  ;;  %vm669_vm1 = vcmp.gt.f32.partialorder %v3821_v10, %v653_v9 }
 0x2b5   : > { %v3917_v13 = vsel %vm669_vm1, %v3821_v10, 0.0 }
 0x2b6   : > { %v731_v6 = vsel %vm493_vm0, %v3917_v13, 0.0 }
 0x2b7   : > { %732 = vadd.xlane.f32.xlu1 %v731_v6 }
 0x324   : > { %v688_v7 = vpop.xlane.xlu0 %687 }
 0x325   : > { %v734_v19 = vmax.f32 %v688_v7, 1e-12 }
 0x327   : > { %3078 = vrcp.f32 %v734_v19 }
 0x328   : > { %v691_v20 = vpop.xlane.xlu1 %690 }
 0x329   : > { %v735_v10 = vmax.f32 %v691_v20, 1e-12  ;;  %v694_v21 = vpop.xlane.xlu0 %693 }
 0x32a   : > { %v736_v24 = vmax.f32 %v694_v21, 1e-12 }
 0x32b   : > { %3080 = vrcp.f32 %v735_v10 }
 0x32c   : > { %3082 = vrcp.f32 %v736_v24  ;;  %v697_v25 = vpop.xlane.xlu1 %696 }
 0x32d   : > { %v737_v15 = vmax.f32 %v697_v25, 1e-12  ;;  %v700_v28 = vpop.xlane.xlu0 %699 }
 0x32e   : > { %v738_v29 = vmax.f32 %v700_v28, 1e-12 }
 0x32f   : > { %3084 = vrcp.f32 %v737_v15 }
 0x330   : > { %3086 = vrcp.f32 %v738_v29  ;;  %v703_v23 = vpop.xlane.xlu1 %702 }
 0x331   : > { %v3079_v31 = vpop.eup %3078  ;;  %v739_v32 = vmax.f32 %v703_v23, 1e-12  ;;  %v706_v26 = vpop.xlane.xlu0 %705 }
 0x332   : > { %v740_v35 = vmax.f32 %v706_v26, 1e-12  ;;  %v782_v37 = vmul.f32 %v3079_v31, %v3827_v16 }
 0x333   : > { %3088 = vrcp.f32 %v739_v32 }
 0x334   : > { %3090 = vrcp.f32 %v740_v35  ;;  %v709_v33 = vpop.xlane.xlu1 %708  ;;  %2791 = vmatprep.mubr.msk.f32.mxu1 %vm493_vm0, %v782_v37 }
 0x335   : > { %v3081_v39 = vpop.eup %3080  ;;  %v741_v40 = vmax.f32 %v709_v33, 1e-12  ;;  %v712_v36 = vpop.xlane.xlu0 %711 }
 0x336   : > { %v3083_v42 = vpop.eup %3082  ;;  %v742_v44 = vmax.f32 %v712_v36, 1e-12  ;;  %v783_v43 = vmul.f32 %v3081_v39, %v3833_v22 }
 0x337   : > { %3092 = vrcp.f32 %v741_v40  ;;  %v784_v48 = vmul.f32 %v3083_v42, %v3839_v27 }
 0x338   : > { %3094 = vrcp.f32 %v742_v44  ;;  %v715_v49 = vpop.xlane.xlu1 %714  ;;  %2792 = vmatmul.mubr.msk.f32.vlgmr.msra.gmra.mrb[0].mxu1 %vm493_vm0, %v783_v43 }
 0x339   : > { %v3085_v16 = vpop.eup %3084  ;;  %v743_v46 = vmax.f32 %v715_v49, 1e-12  ;;  %v718_v47 = vpop.xlane.xlu0 %717  ;;  %2794 = vmatprep.mubr.msk.f32.mxu1 %vm493_vm0, %v784_v48  ;;  %2958 = vmatpush3.bf16.xpose.msra.mxu1 %v3921_v18 }
 0x33a   : > { %v3087_v52 = vpop.eup %3086  ;;  %v744_v53 = vmax.f32 %v718_v47, 1e-12  ;;  %v785_v57 = vmul.f32 %v3085_v16, %v3845_v30  ;;  %2963 = vmatprep.subr.bf16.mxu1 %v3921_v18 }
 0x33b   : > { %3096 = vrcp.f32 %v743_v46  ;;  %v786_v22 = vmul.f32 %v3087_v52, %v3851_v34 }
 0x33c   : > { %3098 = vrcp.f32 %v744_v53  ;;  %v721_v27 = vpop.xlane.xlu1 %720  ;;  %2795 = vmatmul.mubr.msk.f32.gmra.mrb[2].mxu1 %vm493_vm0, %v785_v57 }
 0x33d   : > { %v3089_v58 = vpop.eup %3088  ;;  %v745_v59 = vmax.f32 %v721_v27, 1e-12  ;;  %v724_v61 = vpop.xlane.xlu0 %723  ;;  %2797 = vmatprep.mubr.msk.f32.mxu1 %vm493_vm0, %v786_v22 }
 0x33e   : > { %v3091_v51 = vpop.eup %3090  ;;  %v746_v56 = vmax.f32 %v724_v61, 1e-12  ;;  %v787_v63 = vmul.f32 %v3089_v58, %v3857_v38 }
 0x33f   : > { %3100 = vrcp.f32 %v745_v59  ;;  %v788_v30 = vmul.f32 %v3091_v51, %v3863_v41 }
 0x340   : > { %3102 = vrcp.f32 %v746_v56  ;;  %v727_v1 = vpop.xlane.xlu1 %726  ;;  %2798 = vmatmul.mubr.msk.f32.gmra.mrb[4].mxu1 %vm493_vm0, %v787_v63 }
 0x341   : > { %v3093_v34 = vpop.eup %3092  ;;  %v747_v0 = vmax.f32 %v727_v1, 1e-12  ;;  %v730_v4 = vpop.xlane.xlu0 %729  ;;  %2800 = vmatprep.mubr.msk.f32.mxu1 %vm493_vm0, %v788_v30 }
 0x342   : > { %v3095_v5 = vpop.eup %3094  ;;  %v748_v55 = vmax.f32 %v730_v4, 1e-12  ;;  %v789_v9 = vmul.f32 %v3093_v34, %v3869_v45 }
 0x343   : > { %3104 = vrcp.f32 %v747_v0  ;;  %v790_v11 = vmul.f32 %v3095_v5, %v3875_v50 }
 0x344   : > { %3106 = vrcp.f32 %v748_v55  ;;  %v733_v38 = vpop.xlane.xlu1 %732  ;;  %2801 = vmatmul.mubr.msk.f32.gmra.mrb[6].mxu1 %vm493_vm0, %v789_v9 }
 0x345   : > { %v3097_v41 = vpop.eup %3096  ;;  %v749_v12 = vmax.f32 %v733_v38, 1e-12  ;;  %2803 = vmatprep.mubr.msk.f32.mxu1 %vm493_vm0, %v790_v11 }
 0x346   : > { %v3099_v6 = vpop.eup %3098  ;;  %v791_v14 = vmul.f32 %v3097_v41, %v3881_v54 }
 0x347   : > { %3108 = vrcp.f32 %v749_v12  ;;  %v792_v17 = vmul.f32 %v3099_v6, %v3887_v60 }
 0x348   : > { %2804 = vmatmul.mubr.msk.f32.gmra.mrb[8].mxu1 %vm493_vm0, %v791_v14 }
 0x349   : > { %v3101_v45 = vpop.eup %3100  ;;  %2806 = vmatprep.mubr.msk.f32.mxu1 %vm493_vm0, %v792_v17 }
 0x34a   : > { %v3103_v50 = vpop.eup %3102  ;;  %v793_v7 = vmul.f32 %v3101_v45, %v3893_v62 }
 0x34b   : > { %v794_v19 = vmul.f32 %v3103_v50, %v3899_v2 }
 0x34c   : > { %2807 = vmatmul.mubr.msk.f32.gmra.mrb[10].mxu1 %vm493_vm0, %v793_v7 }
 0x34d   : > { %v3105_v20 = vpop.eup %3104  ;;  %2809 = vmatprep.mubr.msk.f32.mxu1 %vm493_vm0, %v794_v19 }
 0x34e   : > { %v3107_v54 = vpop.eup %3106  ;;  %v795_v10 = vmul.f32 %v3105_v20, %v3905_v8 }
 0x34f   : > { %v796_v60 = vmul.f32 %v3107_v54, %v3911_v3 }
 0x350   : > { %2810 = vmatmul.mubr.msk.f32.gmra.mrb[12].mxu1 %vm493_vm0, %v795_v10 }
 0x351   : > { %v3109_v21 = vpop.eup %3108  ;;  %2812 = vmatprep.mubr.msk.f32.mxu1 %vm493_vm0, %v796_v60 }
 0x352   : > { %v797_v24 = vmul.f32 %v3109_v21, %v3917_v13 }
 0x354   : > { %2813 = vmatmul.mubr.msk.f32.gmra.mrb[14].mxu1 %vm493_vm0, %v797_v24  ;;  %vm1136_vm0 = vcmask 130048  }
 0x40b   : > { %v2793_v62 = vpop.f32.mrb[0].mxu1 }
 0x40c   : > { %2298 = vst [vmem:[%s3961_s27 + $0x8] sm:$0xff] %v2793_v62  ;;  %v912_v2 = vpop.f32.mrb[1].mxu1 }
 0x40d   : > { %2297 = vst [vmem:[%s3961_s27] sm:$0xff] %v912_v2  ;;  %2819 = vmatprep.mubr.f32.mxu1 %v912_v2 }
 0x40e   : > { %2820 = vmatmul.mubr.f32.vlgmr.msra.gmra.mrb[16].mxu1 %v2793_v62 }
 0x40f   : > { %v2796_v8 = vpop.f32.mrb[2].mxu1  ;;  %2964 = vmatpush3.bf16.msra.mxu1 %v3921_v18 }
 0x410   : > { %2300 = vst [vmem:[%s3961_s27 + $0x18] sm:$0xff] %v2796_v8  ;;  %v922_v3 = vpop.f32.mrb[3].mxu1 }
 0x411   : > { %2299 = vst [vmem:[%s3961_s27 + $0x10] sm:$0xff] %v922_v3  ;;  %2822 = vmatprep.mubr.f32.mxu1 %v922_v3 }
 0x412   : > { %2823 = vmatmul.mubr.f32.gmra.mrb[18].mxu1 %v2796_v8 }
 0x413   : > { %v2799_v13 = vpop.f32.mrb[4].mxu1 }
 0x414   : > { %2302 = vst [vmem:[%s3961_s27 + $0x28] sm:$0xff] %v2799_v13  ;;  %v932_v25 = vpop.f32.mrb[5].mxu1 }
 0x415   : > { %2301 = vst [vmem:[%s3961_s27 + $0x20] sm:$0xff] %v932_v25  ;;  %2825 = vmatprep.mubr.f32.mxu1 %v932_v25 }
 0x416   : > { %2826 = vmatmul.mubr.f32.gmra.mrb[20].mxu1 %v2799_v13 }
 0x417   : > { %v2802_v15 = vpop.f32.mrb[6].mxu1 }
 0x418   : > { %2304 = vst [vmem:[%s3961_s27 + $0x38] sm:$0xff] %v2802_v15  ;;  %v942_v28 = vpop.f32.mrb[7].mxu1 }
 0x419   : > { %2303 = vst [vmem:[%s3961_s27 + $0x30] sm:$0xff] %v942_v28  ;;  %2828 = vmatprep.mubr.f32.mxu1 %v942_v28 }
 0x41a   : > { %2829 = vmatmul.mubr.f32.gmra.mrb[22].mxu1 %v2802_v15 }
 0x41b   : > { %v2805_v18 = vpop.f32.mrb[8].mxu1 }
 0x41c   : > { %2306 = vst [vmem:[%s3961_s27 + $0x48] sm:$0xff] %v2805_v18  ;;  %v952_v29 = vpop.f32.mrb[9].mxu1 }
 0x41d   : > { %2305 = vst [vmem:[%s3961_s27 + $0x40] sm:$0xff] %v952_v29  ;;  %2831 = vmatprep.mubr.f32.mxu1 %v952_v29 }
 0x41e   : > { %2832 = vmatmul.mubr.f32.gmra.mrb[24].mxu1 %v2805_v18 }
 0x41f   : > { %v2808_v23 = vpop.f32.mrb[10].mxu1 }
 0x420   : > { %2308 = vst [vmem:[%s3961_s27 + $0x58] sm:$0xff] %v2808_v23  ;;  %v962_v31 = vpop.f32.mrb[11].mxu1 }
 0x421   : > { %2307 = vst [vmem:[%s3961_s27 + $0x50] sm:$0xff] %v962_v31  ;;  %2834 = vmatprep.mubr.f32.mxu1 %v962_v31 }
 0x422   : > { %2835 = vmatmul.mubr.f32.gmra.mrb[26].mxu1 %v2808_v23 }
 0x423   : > { %v2811_v32 = vpop.f32.mrb[12].mxu1 }
 0x424   : > { %2310 = vst [vmem:[%s3961_s27 + $0x68] sm:$0xff] %v2811_v32  ;;  %v972_v26 = vpop.f32.mrb[13].mxu1 }
 0x425   : > { %2309 = vst [vmem:[%s3961_s27 + $0x60] sm:$0xff] %v972_v26  ;;  %2837 = vmatprep.mubr.f32.mxu1 %v972_v26 }
 0x426   : > { %2838 = vmatmul.mubr.f32.gmra.mrb[28].mxu1 %v2811_v32 }
 0x427   : > { %v2814_v35 = vpop.f32.mrb[14].mxu1 }
 0x428   : > { %2312 = vst [vmem:[%s3961_s27 + $0x78] sm:$0xff] %v2814_v35  ;;  %v982_v37 = vpop.f32.mrb[15].mxu1 }
 0x429   : > { %2311 = vst [vmem:[%s3961_s27 + $0x70] sm:$0xff] %v982_v37  ;;  %2840 = vmatprep.mubr.f32.mxu1 %v982_v37 }
 0x42a   : > { %2841 = vmatmul.mubr.f32.gmra.mrb[30].mxu1 %v2814_v35 }
 0x4e1   : > { %v2821_v33 = vpop.f32.mrb[16].mxu1 }
 0x4e2   : > { %v1057_v39 = vpop.f32.mrb[17].mxu1  ;;  %v1140_v40 = vsel %vm1136_vm0, %v2821_v33, -inf }
 0x4e3   : > { %1141 = vmax.xlane.f32.xlu1 %v1140_v40  ;;  %v1137_v36 = vsel %vm1136_vm0, %v1057_v39, -inf }
 0x4e4   : > { %1138 = vmax.xlane.f32.xlu0 %v1137_v36 }
 0x4e5   : > { %v2824_v42 = vpop.f32.mrb[18].mxu1 }
 0x4e6   : > { %v1067_v44 = vpop.f32.mrb[19].mxu1  ;;  %v1146_v43 = vsel %vm1136_vm0, %v2824_v42, -inf }
 0x4e7   : > { %1147 = vmax.xlane.f32.xlu1 %v1146_v43  ;;  %v1143_v48 = vsel %vm1136_vm0, %v1067_v44, -inf }
 0x4e8   : > { %1144 = vmax.xlane.f32.xlu0 %v1143_v48 }
 0x4e9   : > { %v2827_v49 = vpop.f32.mrb[20].mxu1 }
 0x4ea   : > { %v1077_v16 = vpop.f32.mrb[21].mxu1  ;;  %v1152_v46 = vsel %vm1136_vm0, %v2827_v49, -inf }
 0x4eb   : > { %1153 = vmax.xlane.f32.xlu1 %v1152_v46  ;;  %v1149_v47 = vsel %vm1136_vm0, %v1077_v16, -inf }
 0x4ec   : > { %1150 = vmax.xlane.f32.xlu0 %v1149_v47 }
 0x4ed   : > { %v2830_v52 = vpop.f32.mrb[22].mxu1 }
 0x4ee   : > { %v1087_v53 = vpop.f32.mrb[23].mxu1  ;;  %v1158_v57 = vsel %vm1136_vm0, %v2830_v52, -inf }
 0x4ef   : > { %1159 = vmax.xlane.f32.xlu1 %v1158_v57  ;;  %v1155_v22 = vsel %vm1136_vm0, %v1087_v53, -inf }
 0x4f0   : > { %1156 = vmax.xlane.f32.xlu0 %v1155_v22 }
 0x4f1   : > { %v3988_v27 = vpop.f32.mrb[24].mxu1 }
 0x4f2   : > { %v3990_v58 = vpop.f32.mrb[25].mxu1  ;;  %v1164_v59 = vsel %vm1136_vm0, %v3988_v27, -inf }
 0x4f3   : > { %1165 = vmax.xlane.f32.xlu1 %v1164_v59  ;;  %v1161_v61 = vsel %vm1136_vm0, %v3990_v58, -inf }
 0x4f4   : > { %1162 = vmax.xlane.f32.xlu0 %v1161_v61 }
 0x4f5   : > { %v3996_v51 = vpop.f32.mrb[26].mxu1 }
 0x4f6   : > { %v3998_v56 = vpop.f32.mrb[27].mxu1  ;;  %v1170_v63 = vsel %vm1136_vm0, %v3996_v51, -inf }
 0x4f7   : > { %1171 = vmax.xlane.f32.xlu1 %v1170_v63  ;;  %v1167_v30 = vsel %vm1136_vm0, %v3998_v56, -inf }
 0x4f8   : > { %1168 = vmax.xlane.f32.xlu0 %v1167_v30 }
 0x4f9   : > { %v4004_v1 = vpop.f32.mrb[28].mxu1 }
 0x4fa   : > { %v4006_v34 = vpop.f32.mrb[29].mxu1  ;;  %v1176_v0 = vsel %vm1136_vm0, %v4004_v1, -inf }
 0x4fb   : > { %1177 = vmax.xlane.f32.xlu1 %v1176_v0  ;;  %v1173_v4 = vsel %vm1136_vm0, %v4006_v34, -inf }
 0x4fc   : > { %1174 = vmax.xlane.f32.xlu0 %v1173_v4 }
 0x4fd   : > { %v4012_v5 = vpop.f32.mrb[30].mxu1 }
 0x4fe   : > { %v4014_v55 = vpop.f32.mrb[31].mxu1  ;;  %v1182_v9 = vsel %vm1136_vm0, %v4012_v5, -inf }
 0x4ff   : > { %1183 = vmax.xlane.f32.xlu1 %v1182_v9  ;;  %v1179_v11 = vsel %vm1136_vm0, %v4014_v55, -inf }
 0x500   : > { %1180 = vmax.xlane.f32.xlu0 %v1179_v11 }
 0x570   : > { %v1142_v38 = vpop.xlane.xlu1 %1141 }
 0x571   : > { %v1186_v41 = vsub.f32 %v2821_v33, %v1142_v38  ;;  %v1139_v12 = vpop.xlane.xlu0 %1138 }
 0x572   : > { %v1185_v6 = vsub.f32 %v1057_v39, %v1139_v12 }
 0x573   : > { %v1203_v14 = vmul.f32 1.442695, %v1186_v41 }
 0x574   : > { %v1201_v17 = vmul.f32 1.442695, %v1185_v6  ;;  %v1148_v45 = vpop.xlane.xlu1 %1147 }
 0x575   : > { %3110 = vpow2.f32 %v1203_v14  ;;  %v1188_v50 = vsub.f32 %v2824_v42, %v1148_v45  ;;  %v1145_v7 = vpop.xlane.xlu0 %1144 }
 0x576   : > { %3112 = vpow2.f32 %v1201_v17  ;;  %v1187_v19 = vsub.f32 %v1067_v44, %v1145_v7 }
 0x577   : > { %v1207_v20 = vmul.f32 1.442695, %v1188_v50 }
 0x578   : > { %v1205_v54 = vmul.f32 1.442695, %v1187_v19  ;;  %v1154_v10 = vpop.xlane.xlu1 %1153 }
 0x579   : > { %3114 = vpow2.f32 %v1207_v20  ;;  %v1190_v60 = vsub.f32 %v2827_v49, %v1154_v10  ;;  %v1151_v21 = vpop.xlane.xlu0 %1150 }
 0x57a   : > { %3116 = vpow2.f32 %v1205_v54  ;;  %v1189_v24 = vsub.f32 %v1077_v16, %v1151_v21 }
 0x57b   : > { %v1211_v62 = vmul.f32 1.442695, %v1190_v60 }
 0x57c   : > { %v1209_v2 = vmul.f32 1.442695, %v1189_v24  ;;  %v1160_v8 = vpop.xlane.xlu1 %1159 }
 0x57d   : > { %3118 = vpow2.f32 %v1211_v62  ;;  %v1192_v3 = vsub.f32 %v2830_v52, %v1160_v8  ;;  %v1157_v13 = vpop.xlane.xlu0 %1156 }
 0x57e   : > { %3120 = vpow2.f32 %v1209_v2  ;;  %v1191_v25 = vsub.f32 %v1087_v53, %v1157_v13 }
 0x57f   : > { %v4020_v15 = vpop.eup %3110  ;;  %v1215_v28 = vmul.f32 1.442695, %v1192_v3 }
 0x580   : > { %v4022_v18 = vpop.eup %3112  ;;  %v1213_v29 = vmul.f32 1.442695, %v1191_v25  ;;  %v1166_v23 = vpop.xlane.xlu1 %1165  ;;  %v1236_v31 = vsel %vm1136_vm0, %v4020_v15, 0.0 }
 0x581   : > { %3122 = vpow2.f32 %v1215_v28  ;;  %v1194_v32 = vsub.f32 %v3988_v27, %v1166_v23  ;;  %v1163_v26 = vpop.xlane.xlu0 %1162  ;;  %1237 = vadd.xlane.f32.xlu1 %v1236_v31  ;;  %v1233_v35 = vsel %vm1136_vm0, %v4022_v18, 0.0 }
 0x582   : > { %3124 = vpow2.f32 %v1213_v29  ;;  %v1193_v37 = vsub.f32 %v3990_v58, %v1163_v26  ;;  %1234 = vadd.xlane.f32.xlu0 %v1233_v35 }
 0x583   : > { %v4030_v33 = vpop.eup %3114  ;;  %v1219_v39 = vmul.f32 1.442695, %v1194_v32 }
 0x584   : > { %v4032_v40 = vpop.eup %3116  ;;  %v1217_v36 = vmul.f32 1.442695, %v1193_v37  ;;  %v1172_v42 = vpop.xlane.xlu1 %1171  ;;  %v1242_v44 = vsel %vm1136_vm0, %v4030_v33, 0.0 }
 0x585   : > { %3126 = vpow2.f32 %v1219_v39  ;;  %v1196_v43 = vsub.f32 %v3996_v51, %v1172_v42  ;;  %v1169_v48 = vpop.xlane.xlu0 %1168  ;;  %1243 = vadd.xlane.f32.xlu1 %v1242_v44  ;;  %v1239_v49 = vsel %vm1136_vm0, %v4032_v40, 0.0 }
 0x586   : > { %3128 = vpow2.f32 %v1217_v36  ;;  %v1195_v16 = vsub.f32 %v3998_v56, %v1169_v48  ;;  %1240 = vadd.xlane.f32.xlu0 %v1239_v49 }
 0x587   : > { %v4040_v46 = vpop.eup %3118  ;;  %v1223_v47 = vmul.f32 1.442695, %v1196_v43 }
 0x588   : > { %v4042_v52 = vpop.eup %3120  ;;  %v1221_v53 = vmul.f32 1.442695, %v1195_v16  ;;  %v1178_v57 = vpop.xlane.xlu1 %1177  ;;  %v1248_v22 = vsel %vm1136_vm0, %v4040_v46, 0.0 }
 0x589   : > { %3130 = vpow2.f32 %v1223_v47  ;;  %v1198_v27 = vsub.f32 %v4004_v1, %v1178_v57  ;;  %v1175_v58 = vpop.xlane.xlu0 %1174  ;;  %1249 = vadd.xlane.f32.xlu1 %v1248_v22  ;;  %v1245_v59 = vsel %vm1136_vm0, %v4042_v52, 0.0 }
 0x58a   : > { %3132 = vpow2.f32 %v1221_v53  ;;  %v1197_v61 = vsub.f32 %v4006_v34, %v1175_v58  ;;  %1246 = vadd.xlane.f32.xlu0 %v1245_v59 }
 0x58b   : > { %v4050_v51 = vpop.eup %3122  ;;  %v1227_v56 = vmul.f32 1.442695, %v1198_v27 }
 0x58c   : > { %v4052_v63 = vpop.eup %3124  ;;  %v1225_v30 = vmul.f32 1.442695, %v1197_v61  ;;  %v1184_v0 = vpop.xlane.xlu1 %1183  ;;  %v1254_v4 = vsel %vm1136_vm0, %v4050_v51, 0.0 }
 0x58d   : > { %3134 = vpow2.f32 %v1227_v56  ;;  %v1200_v1 = vsub.f32 %v4012_v5, %v1184_v0  ;;  %1255 = vadd.xlane.f32.xlu1 %v1254_v4  ;;  %v1181_v9 = vpop.xlane.xlu0 %1180  ;;  %v1251_v11 = vsel %vm1136_vm0, %v4052_v63, 0.0 }
 0x58e   : > { %3136 = vpow2.f32 %v1225_v30  ;;  %v1199_v34 = vsub.f32 %v4014_v55, %v1181_v9  ;;  %1252 = vadd.xlane.f32.xlu0 %v1251_v11 }
 0x58f   : > { %v4060_v38 = vpop.eup %3126  ;;  %v1231_v41 = vmul.f32 1.442695, %v1200_v1 }
 0x590   : > { %v4062_v12 = vpop.eup %3128  ;;  %v1229_v6 = vmul.f32 1.442695, %v1199_v34  ;;  %v1260_v14 = vsel %vm1136_vm0, %v4060_v38, 0.0 }
 0x591   : > { %3138 = vpow2.f32 %v1231_v41  ;;  %1261 = vadd.xlane.f32.xlu1 %v1260_v14  ;;  %v1257_v5 = vsel %vm1136_vm0, %v4062_v12, 0.0 }
 0x592   : > { %3140 = vpow2.f32 %v1229_v6  ;;  %1258 = vadd.xlane.f32.xlu0 %v1257_v5 }
 0x593   : > { %v4068_v17 = vpop.eup %3130 }
 0x594   : > { %v4070_v55 = vpop.eup %3132  ;;  %v1266_v45 = vsel %vm1136_vm0, %v4068_v17, 0.0 }
 0x595   : > { %1267 = vadd.xlane.f32.xlu1 %v1266_v45  ;;  %v1263_v50 = vsel %vm1136_vm0, %v4070_v55, 0.0 }
 0x596   : > { %1264 = vadd.xlane.f32.xlu0 %v1263_v50 }
 0x597   : > { %v4076_v7 = vpop.eup %3134 }
 0x598   : > { %v4078_v19 = vpop.eup %3136  ;;  %v1272_v20 = vsel %vm1136_vm0, %v4076_v7, 0.0 }
 0x599   : > { %1273 = vadd.xlane.f32.xlu1 %v1272_v20  ;;  %v1269_v54 = vsel %vm1136_vm0, %v4078_v19, 0.0 }
 0x59a   : > { %1270 = vadd.xlane.f32.xlu0 %v1269_v54 }
 0x59b   : > { %v4084_v10 = vpop.eup %3138 }
 0x59c   : > { %v4086_v60 = vpop.eup %3140  ;;  %v1278_v21 = vsel %vm1136_vm0, %v4084_v10, 0.0 }
 0x59d   : > { %1279 = vadd.xlane.f32.xlu1 %v1278_v21  ;;  %v1275_v24 = vsel %vm1136_vm0, %v4086_v60, 0.0 }
 0x59e   : > { %1276 = vadd.xlane.f32.xlu0 %v1275_v24 }
 0x60e   : > { %v1238_v62 = vpop.xlane.xlu1 %1237 }
 0x60f   : > { %v1282_v2 = vmul.f32 0.0025, %v1238_v62  ;;  %v1235_v8 = vpop.xlane.xlu0 %1234 }
 0x610   : > { %v1281_v3 = vmul.f32 0.0025, %v1235_v8  ;;  %v4191_v8 = vld [vmem:[%s4639_s3] sm:$0xf] }
 0x611   : > { %vm1298_vm2 = vcmp.gt.f32.partialorder %v4020_v15, %v1282_v2  ;;  %2871 = vmatprep.subr.mxu1 %v4191_v8 }
 0x612   : > { %v1244_v13 = vpop.xlane.xlu1 %1243  ;;  %v4094_v25 = vsel %vm1298_vm2, %v4020_v15, 0.0  ;;  %vm1297_vm3 = vcmp.gt.f32.partialorder %v4022_v18, %v1281_v3 }
 0x613   : > { %v1284_v28 = vmul.f32 0.0025, %v1244_v13  ;;  %v1241_v29 = vpop.xlane.xlu0 %1240  ;;  %v1332_v23 = vsel %vm1136_vm0, %v4094_v25, 0.0  ;;  %v4100_v31 = vsel %vm1297_vm3, %v4022_v18, 0.0  ;;  %vm2132_vm3 = vcmask 1043456  }
 0x614   : > { %v1283_v32 = vmul.f32 0.0025, %v1241_v29  ;;  %1333 = vadd.xlane.f32.xlu1 %v1332_v23  ;;  %v1329_v26 = vsel %vm1136_vm0, %v4100_v31, 0.0  ;;  %2897 = vmatprep.subr.msk.mxu0 %vm2132_vm3, %v4191_v8 }
 0x615   : > { %1330 = vadd.xlane.f32.xlu0 %v1329_v26  ;;  %vm1300_vm4 = vcmp.gt.f32.partialorder %v4030_v33, %v1284_v28 }
 0x616   : > { %v1250_v15 = vpop.xlane.xlu1 %1249  ;;  %v4106_v35 = vsel %vm1300_vm4, %v4030_v33, 0.0  ;;  %vm1299_vm5 = vcmp.gt.f32.partialorder %v4032_v40, %v1283_v32 }
 0x617   : > { %v1286_v37 = vmul.f32 0.0025, %v1250_v15  ;;  %v1247_v39 = vpop.xlane.xlu0 %1246  ;;  %v1338_v18 = vsel %vm1136_vm0, %v4106_v35, 0.0  ;;  %v4112_v36 = vsel %vm1299_vm5, %v4032_v40, 0.0 }
 0x618   : > { %v1285_v42 = vmul.f32 0.0025, %v1247_v39  ;;  %1339 = vadd.xlane.f32.xlu1 %v1338_v18  ;;  %v1335_v44 = vsel %vm1136_vm0, %v4112_v36, 0.0 }
 0x619   : > { %1336 = vadd.xlane.f32.xlu0 %v1335_v44  ;;  %vm1302_vm6 = vcmp.gt.f32.partialorder %v4040_v46, %v1286_v37 }
 0x61a   : > { %v1256_v33 = vpop.xlane.xlu1 %1255  ;;  %v4118_v43 = vsel %vm1302_vm6, %v4040_v46, 0.0  ;;  %vm1301_vm7 = vcmp.gt.f32.partialorder %v4042_v52, %v1285_v42 }
 0x61b   : > { %v1288_v48 = vmul.f32 0.0025, %v1256_v33  ;;  %v1253_v49 = vpop.xlane.xlu0 %1252  ;;  %v1344_v40 = vsel %vm1136_vm0, %v4118_v43, 0.0  ;;  %v4124_v16 = vsel %vm1301_vm7, %v4042_v52, 0.0 }
 0x61c   : > { %v1287_v47 = vmul.f32 0.0025, %v1253_v49  ;;  %1345 = vadd.xlane.f32.xlu1 %v1344_v40  ;;  %v1341_v53 = vsel %vm1136_vm0, %v4124_v16, 0.0 }
 0x61d   : > { %1342 = vadd.xlane.f32.xlu0 %v1341_v53  ;;  %vm1304_vm8 = vcmp.gt.f32.partialorder %v4050_v51, %v1288_v48 }
 0x61e   : > { %v1262_v46 = vpop.xlane.xlu1 %1261  ;;  %v4130_v57 = vsel %vm1304_vm8, %v4050_v51, 0.0  ;;  %vm1303_vm9 = vcmp.gt.f32.partialorder %v4052_v63, %v1287_v47 }
 0x61f   : > { %v1290_v22 = vmul.f32 0.0025, %v1262_v46  ;;  %v1259_v27 = vpop.xlane.xlu0 %1258  ;;  %v1350_v52 = vsel %vm1136_vm0, %v4130_v57, 0.0  ;;  %v4136_v58 = vsel %vm1303_vm9, %v4052_v63, 0.0 }
 0x620   : > { %v1289_v59 = vmul.f32 0.0025, %v1259_v27  ;;  %1351 = vadd.xlane.f32.xlu1 %v1350_v52  ;;  %v1347_v61 = vsel %vm1136_vm0, %v4136_v58, 0.0 }
 0x621   : > { %1348 = vadd.xlane.f32.xlu0 %v1347_v61  ;;  %vm1306_vm10 = vcmp.gt.f32.partialorder %v4060_v38, %v1290_v22 }
 0x622   : > { %v1268_v51 = vpop.xlane.xlu1 %1267  ;;  %v4142_v56 = vsel %vm1306_vm10, %v4060_v38, 0.0  ;;  %vm1305_vm11 = vcmp.gt.f32.partialorder %v4062_v12, %v1289_v59 }
 0x623   : > { %v1292_v30 = vmul.f32 0.0025, %v1268_v51  ;;  %v1265_v0 = vpop.xlane.xlu0 %1264  ;;  %v1356_v63 = vsel %vm1136_vm0, %v4142_v56, 0.0  ;;  %v4148_v4 = vsel %vm1305_vm11, %v4062_v12, 0.0 }
 0x624   : > { %v1291_v1 = vmul.f32 0.0025, %v1265_v0  ;;  %1357 = vadd.xlane.f32.xlu1 %v1356_v63  ;;  %v1353_v9 = vsel %vm1136_vm0, %v4148_v4, 0.0 }
 0x625   : > { %1354 = vadd.xlane.f32.xlu0 %v1353_v9  ;;  %vm1308_vm12 = vcmp.gt.f32.partialorder %v4068_v17, %v1292_v30 }
 0x626   : > { %v1274_v11 = vpop.xlane.xlu1 %1273  ;;  %v4154_v34 = vsel %vm1308_vm12, %v4068_v17, 0.0  ;;  %vm1307_vm13 = vcmp.gt.f32.partialorder %v4070_v55, %v1291_v1 }
 0x627   : > { %v1294_v38 = vmul.f32 0.0025, %v1274_v11  ;;  %v1271_v41 = vpop.xlane.xlu0 %1270  ;;  %v1362_v12 = vsel %vm1136_vm0, %v4154_v34, 0.0  ;;  %v4160_v6 = vsel %vm1307_vm13, %v4070_v55, 0.0 }
 0x628   : > { %v1293_v14 = vmul.f32 0.0025, %v1271_v41  ;;  %1363 = vadd.xlane.f32.xlu1 %v1362_v12  ;;  %v1359_v5 = vsel %vm1136_vm0, %v4160_v6, 0.0 }
 0x629   : > { %1360 = vadd.xlane.f32.xlu0 %v1359_v5  ;;  %vm1310_vm14 = vcmp.gt.f32.partialorder %v4076_v7, %v1294_v38 }
 0x62a   : > { %v1280_v17 = vpop.xlane.xlu1 %1279  ;;  %v4166_v45 = vsel %vm1310_vm14, %v4076_v7, 0.0  ;;  %vm1309_vm15 = vcmp.gt.f32.partialorder %v4078_v19, %v1293_v14 }
 0x62b   : > { %v1296_v50 = vmul.f32 0.0025, %v1280_v17  ;;  %v1277_v20 = vpop.xlane.xlu0 %1276  ;;  %v1368_v55 = vsel %vm1136_vm0, %v4166_v45, 0.0  ;;  %v4172_v54 = vsel %vm1309_vm15, %v4078_v19, 0.0 }
 0x62c   : > { %v1295_v21 = vmul.f32 0.0025, %v1277_v20  ;;  %1369 = vadd.xlane.f32.xlu1 %v1368_v55  ;;  %v1365_v24 = vsel %vm1136_vm0, %v4172_v54, 0.0 }
 0x62d   : > { %1366 = vadd.xlane.f32.xlu0 %v1365_v24  ;;  %vm1312_vm1 = vcmp.gt.f32.partialorder %v4084_v10, %v1296_v50 }
 0x62e   : > { %v4178_v7 = vsel %vm1312_vm1, %v4084_v10, 0.0  ;;  %vm1311_vm2 = vcmp.gt.f32.partialorder %v4086_v60, %v1295_v21 }
 0x62f   : > { %v1374_v62 = vsel %vm1136_vm0, %v4178_v7, 0.0  ;;  %v4184_v2 = vsel %vm1311_vm2, %v4086_v60, 0.0 }
 0x630   : > { %1375 = vadd.xlane.f32.xlu1 %v1374_v62  ;;  %v1371_v19 = vsel %vm1136_vm0, %v4184_v2, 0.0 }
 0x631   : > { %1372 = vadd.xlane.f32.xlu0 %v1371_v19 }
 0x6a1   : > { %v1334_v10 = vpop.xlane.xlu1 %1333 }
 0x6a2   : > { %v1378_v3 = vmax.f32 %v1334_v10, 1e-12  ;;  %v1331_v13 = vpop.xlane.xlu0 %1330 }
 0x6a3   : > { %v1377_v28 = vmax.f32 %v1331_v13, 1e-12 }
 0x6a4   : > { %3142 = vrcp.f32 %v1378_v3 }
 0x6a5   : > { %3144 = vrcp.f32 %v1377_v28  ;;  %v1340_v60 = vpop.xlane.xlu1 %1339 }
 0x6a6   : > { %v1380_v29 = vmax.f32 %v1340_v60, 1e-12  ;;  %v1337_v23 = vpop.xlane.xlu0 %1336 }
 0x6a7   : > { %v1379_v32 = vmax.f32 %v1337_v23, 1e-12 }
 0x6a8   : > { %3146 = vrcp.f32 %v1380_v29 }
 0x6a9   : > { %3148 = vrcp.f32 %v1379_v32  ;;  %v1346_v26 = vpop.xlane.xlu1 %1345 }
 0x6aa   : > { %v1382_v15 = vmax.f32 %v1346_v26, 1e-12  ;;  %v1343_v37 = vpop.xlane.xlu0 %1342 }
 0x6ab   : > { %v1381_v39 = vmax.f32 %v1343_v37, 1e-12 }
 0x6ac   : > { %3150 = vrcp.f32 %v1382_v15 }
 0x6ad   : > { %3152 = vrcp.f32 %v1381_v39  ;;  %v1352_v18 = vpop.xlane.xlu1 %1351 }
 0x6ae   : > { %v3143_v42 = vpop.eup %3142  ;;  %v1384_v44 = vmax.f32 %v1352_v18, 1e-12  ;;  %v1349_v33 = vpop.xlane.xlu0 %1348 }
 0x6af   : > { %v3145_v48 = vpop.eup %3144  ;;  %v1383_v49 = vmax.f32 %v1349_v33, 1e-12  ;;  %v1426_v47 = vmul.f32 %v3143_v42, %v4094_v25 }
 0x6b0   : > { %3154 = vrcp.f32 %v1384_v44  ;;  %v1425_v40 = vmul.f32 %v3145_v48, %v4100_v31 }
 0x6b1   : > { %3156 = vrcp.f32 %v1383_v49  ;;  %v1358_v53 = vpop.xlane.xlu1 %1357 }
 0x6b2   : > { %v3147_v46 = vpop.eup %3146  ;;  %v1386_v22 = vmax.f32 %v1358_v53, 1e-12  ;;  %2847 = vmatprep.mubr.msk.f32.mxu0 %vm1136_vm0, %v1425_v40  ;;  %v1355_v27 = vpop.xlane.xlu0 %1354 }
 0x6b3   : > { %v3149_v52 = vpop.eup %3148  ;;  %v1385_v59 = vmax.f32 %v1355_v27, 1e-12  ;;  %2848 = vmatmul.mubr.msk.f32.vlgmr.msra.gmra.mrb[16].mxu0 %vm1136_vm0, %v1426_v47  ;;  %v1428_v31 = vmul.f32 %v3147_v46, %v4106_v35 }
 0x6b4   : > { %3158 = vrcp.f32 %v1386_v22  ;;  %v1427_v61 = vmul.f32 %v3149_v52, %v4112_v36  ;;  %2898 = vmatpush3.msk.msra.mxu0 %vm2132_vm3, %v4191_v8 }
 0x6b5   : > { %3160 = vrcp.f32 %v1385_v59  ;;  %v1364_v51 = vpop.xlane.xlu1 %1363 }
 0x6b6   : > { %v3151_v30 = vpop.eup %3150  ;;  %v1388_v25 = vmax.f32 %v1364_v51, 1e-12  ;;  %2850 = vmatprep.mubr.msk.f32.mxu0 %vm1136_vm0, %v1427_v61  ;;  %v1361_v0 = vpop.xlane.xlu0 %1360 }
 0x6b7   : > { %v3153_v63 = vpop.eup %3152  ;;  %v1387_v1 = vmax.f32 %v1361_v0, 1e-12  ;;  %2851 = vmatmul.mubr.msk.f32.gmra.mrb[18].mxu0 %vm1136_vm0, %v1428_v31  ;;  %v1430_v36 = vmul.f32 %v3151_v30, %v4118_v43 }
 0x6b8   : > { %3162 = vrcp.f32 %v1388_v25  ;;  %v1429_v9 = vmul.f32 %v3153_v63, %v4124_v16 }
 0x6b9   : > { %3164 = vrcp.f32 %v1387_v1  ;;  %v1370_v11 = vpop.xlane.xlu1 %1369 }
 0x6ba   : > { %v3155_v38 = vpop.eup %3154  ;;  %v1390_v41 = vmax.f32 %v1370_v11, 1e-12  ;;  %2853 = vmatprep.mubr.msk.f32.mxu0 %vm1136_vm0, %v1429_v9  ;;  %v1367_v35 = vpop.xlane.xlu0 %1366 }
 0x6bb   : > { %v3157_v12 = vpop.eup %3156  ;;  %v1389_v14 = vmax.f32 %v1367_v35, 1e-12  ;;  %2854 = vmatmul.mubr.msk.f32.gmra.mrb[20].mxu0 %vm1136_vm0, %v1430_v36  ;;  %v1432_v16 = vmul.f32 %v3155_v38, %v4130_v57 }
 0x6bc   : > { %3166 = vrcp.f32 %v1390_v41  ;;  %v1431_v5 = vmul.f32 %v3157_v12, %v4136_v58 }
 0x6bd   : > { %3168 = vrcp.f32 %v1389_v14  ;;  %v1376_v17 = vpop.xlane.xlu1 %1375 }
 0x6be   : > { %v3159_v50 = vpop.eup %3158  ;;  %v1392_v20 = vmax.f32 %v1376_v17, 1e-12  ;;  %2856 = vmatprep.mubr.msk.f32.mxu0 %vm1136_vm0, %v1431_v5  ;;  %v1373_v43 = vpop.xlane.xlu0 %1372 }
 0x6bf   : > { %v3161_v55 = vpop.eup %3160  ;;  %v1391_v21 = vmax.f32 %v1373_v43, 1e-12  ;;  %2857 = vmatmul.mubr.msk.f32.gmra.mrb[22].mxu0 %vm1136_vm0, %v1432_v16  ;;  %v1434_v62 = vmul.f32 %v3159_v50, %v4142_v56 }
 0x6c0   : > { %3170 = vrcp.f32 %v1392_v20  ;;  %v1433_v24 = vmul.f32 %v3161_v55, %v4148_v4 }
 0x6c1   : > { %3172 = vrcp.f32 %v1391_v21 }
 0x6c2   : > { %v3163_v58 = vpop.eup %3162  ;;  %2859 = vmatprep.mubr.msk.f32.mxu0 %vm1136_vm0, %v1433_v24 }
 0x6c3   : > { %v3165_v19 = vpop.eup %3164  ;;  %2860 = vmatmul.mubr.msk.f32.gmra.mrb[24].mxu0 %vm1136_vm0, %v1434_v62  ;;  %v1436_v10 = vmul.f32 %v3163_v58, %v4154_v34 }
 0x6c4   : > { %v1435_v57 = vmul.f32 %v3165_v19, %v4160_v6 }
 0x6c6   : > { %v3167_v3 = vpop.eup %3166  ;;  %2862 = vmatprep.mubr.msk.f32.mxu0 %vm1136_vm0, %v1435_v57 }
 0x6c7   : > { %v3169_v13 = vpop.eup %3168  ;;  %2863 = vmatmul.mubr.msk.f32.gmra.mrb[26].mxu0 %vm1136_vm0, %v1436_v10  ;;  %v1438_v56 = vmul.f32 %v3167_v3, %v4166_v45 }
 0x6c8   : > { %v1437_v4 = vmul.f32 %v3169_v13, %v4172_v54 }
 0x6ca   : > { %v3171_v28 = vpop.eup %3170  ;;  %2865 = vmatprep.mubr.msk.f32.mxu1 %vm1136_vm0, %v1437_v4 }
 0x6cb   : > { %v3173_v60 = vpop.eup %3172  ;;  %2866 = vmatmul.mubr.msk.f32.vlgmr.msra.gmra.mrb[32].mxu1 %vm1136_vm0, %v1438_v56  ;;  %v1440_v34 = vmul.f32 %v3171_v28, %v4178_v7 }
 0x6cc   : > { %v1439_v6 = vmul.f32 %v3173_v60, %v4184_v2  ;;  %2872 = vmatpush3.xpose.msra.mxu1 %v4191_v8 }
 0x6ce   : > { %2868 = vmatprep.mubr.msk.f32.mxu1 %vm1136_vm0, %v1439_v6 }
 0x6cf   : > { %2869 = vmatmul.mubr.msk.f32.gmra.mrb[34].mxu1 %vm1136_vm0, %v1440_v34  ;;  %vm1779_vm0 = vcmask 31744  }
 0x786   : > { %v2849_v29 = vpop.f32.mrb[16].mxu0 }
 0x787   : > { %2314 = vst [vmem:[%s4228_s20 + $0x8] sm:$0xff] %v2849_v29  ;;  %v1555_v45 = vpop.f32.mrb[17].mxu0 }
 0x788   : > { %2313 = vst [vmem:[%s4228_s20] sm:$0xff] %v1555_v45  ;;  %2873 = vmatprep.mubr.f32.mxu1 %v1555_v45 }
 0x789   : > { %2874 = vmatmul.mubr.f32.vlgmr.msra.gmra.mrb[36].mxu1 %v2849_v29 }
 0x78a   : > { %v2852_v54 = vpop.f32.mrb[18].mxu0 }
 0x78b   : > { %2316 = vst [vmem:[%s4228_s20 + $0x18] sm:$0xff] %v2852_v54  ;;  %v1565_v7 = vpop.f32.mrb[19].mxu0 }
 0x78c   : > { %2315 = vst [vmem:[%s4228_s20 + $0x10] sm:$0xff] %v1565_v7  ;;  %2876 = vmatprep.mubr.f32.mxu1 %v1565_v7 }
 0x78d   : > { %2877 = vmatmul.mubr.f32.gmra.mrb[38].mxu1 %v2852_v54 }
 0x78e   : > { %v2855_v2 = vpop.f32.mrb[20].mxu0 }
 0x78f   : > { %2318 = vst [vmem:[%s4228_s20 + $0x28] sm:$0xff] %v2855_v2  ;;  %v1575_v23 = vpop.f32.mrb[21].mxu0 }
 0x790   : > { %2317 = vst [vmem:[%s4228_s20 + $0x20] sm:$0xff] %v1575_v23  ;;  %2879 = vmatprep.mubr.f32.mxu1 %v1575_v23 }
 0x791   : > { %2880 = vmatmul.mubr.f32.gmra.mrb[40].mxu1 %v2855_v2 }
 0x792   : > { %v2858_v32 = vpop.f32.mrb[22].mxu0 }
 0x793   : > { %2320 = vst [vmem:[%s4228_s20 + $0x38] sm:$0xff] %v2858_v32  ;;  %v1585_v26 = vpop.f32.mrb[23].mxu0 }
 0x794   : > { %2319 = vst [vmem:[%s4228_s20 + $0x30] sm:$0xff] %v1585_v26  ;;  %2882 = vmatprep.mubr.f32.mxu1 %v1585_v26 }
 0x795   : > { %2883 = vmatmul.mubr.f32.gmra.mrb[42].mxu1 %v2858_v32 }
 0x796   : > { %v2861_v15 = vpop.f32.mrb[24].mxu0 }
 0x797   : > { %2322 = vst [vmem:[%s4228_s20 + $0x48] sm:$0xff] %v2861_v15  ;;  %v1595_v37 = vpop.f32.mrb[25].mxu0 }
 0x798   : > { %2321 = vst [vmem:[%s4228_s20 + $0x40] sm:$0xff] %v1595_v37  ;;  %2885 = vmatprep.mubr.f32.mxu1 %v1595_v37 }
 0x799   : > { %2886 = vmatmul.mubr.f32.gmra.mrb[44].mxu1 %v2861_v15 }
 0x79a   : > { %v2864_v39 = vpop.f32.mrb[26].mxu0 }
 0x79b   : > { %2324 = vst [vmem:[%s4228_s20 + $0x58] sm:$0xff] %v2864_v39  ;;  %v1605_v18 = vpop.f32.mrb[27].mxu0 }
 0x79c   : > { %2323 = vst [vmem:[%s4228_s20 + $0x50] sm:$0xff] %v1605_v18  ;;  %2888 = vmatprep.mubr.f32.mxu1 %v1605_v18 }
 0x79d   : > { %2889 = vmatmul.mubr.f32.gmra.mrb[46].mxu1 %v2864_v39 }
 0x79e   : > { %v2867_v42 = vpop.f32.mrb[32].mxu1 }
 0x79f   : > { %2326 = vst [vmem:[%s4228_s20 + $0x68] sm:$0xff] %v2867_v42  ;;  %v1615_v44 = vpop.f32.mrb[33].mxu1 }
 0x7a0   : > { %2325 = vst [vmem:[%s4228_s20 + $0x60] sm:$0xff] %v1615_v44  ;;  %2891 = vmatprep.mubr.f32.mxu1 %v1615_v44 }
 0x7a1   : > { %2892 = vmatmul.mubr.f32.gmra.mrb[48].mxu1 %v2867_v42 }
 0x7a2   : > { %v2870_v33 = vpop.f32.mrb[34].mxu1 }
 0x7a3   : > { %2328 = vst [vmem:[%s4228_s20 + $0x78] sm:$0xff] %v2870_v33  ;;  %v1625_v48 = vpop.f32.mrb[35].mxu1 }
 0x7a4   : > { %2327 = vst [vmem:[%s4228_s20 + $0x70] sm:$0xff] %v1625_v48  ;;  %2894 = vmatprep.mubr.f32.mxu1 %v1625_v48 }
 0x7a5   : > { %2895 = vmatmul.mubr.f32.gmra.mrb[50].mxu1 %v2870_v33 }
 0x85c   : > { %v2875_v49 = vpop.f32.mrb[36].mxu1 }
 0x85d   : > { %v1700_v40 = vpop.f32.mrb[37].mxu1  ;;  %v1783_v47 = vsel %vm1779_vm0, %v2875_v49, -inf }
 0x85e   : > { %1784 = vmax.xlane.f32.xlu1 %v1783_v47  ;;  %v1780_v53 = vsel %vm1779_vm0, %v1700_v40, -inf }
 0x85f   : > { %1781 = vmax.xlane.f32.xlu0 %v1780_v53 }
 0x860   : > { %v2878_v46 = vpop.f32.mrb[38].mxu1 }
 0x861   : > { %v1710_v22 = vpop.f32.mrb[39].mxu1  ;;  %v1789_v27 = vsel %vm1779_vm0, %v2878_v46, -inf }
 0x862   : > { %1790 = vmax.xlane.f32.xlu1 %v1789_v27  ;;  %v1786_v52 = vsel %vm1779_vm0, %v1710_v22, -inf }
 0x863   : > { %1787 = vmax.xlane.f32.xlu0 %v1786_v52 }
 0x864   : > { %v2881_v59 = vpop.f32.mrb[40].mxu1 }
 0x865   : > { %v1720_v61 = vpop.f32.mrb[41].mxu1  ;;  %v1795_v51 = vsel %vm1779_vm0, %v2881_v59, -inf }
 0x866   : > { %1796 = vmax.xlane.f32.xlu1 %v1795_v51  ;;  %v1792_v31 = vsel %vm1779_vm0, %v1720_v61, -inf }
 0x867   : > { %1793 = vmax.xlane.f32.xlu0 %v1792_v31 }
 0x868   : > { %v2884_v30 = vpop.f32.mrb[42].mxu1 }
 0x869   : > { %v1730_v25 = vpop.f32.mrb[43].mxu1  ;;  %v1801_v0 = vsel %vm1779_vm0, %v2884_v30, -inf }
 0x86a   : > { %1802 = vmax.xlane.f32.xlu1 %v1801_v0  ;;  %v1798_v63 = vsel %vm1779_vm0, %v1730_v25, -inf }
 0x86b   : > { %1799 = vmax.xlane.f32.xlu0 %v1798_v63 }
 0x86c   : > { %v4254_v1 = vpop.f32.mrb[44].mxu1 }
 0x86d   : > { %v4256_v9 = vpop.f32.mrb[45].mxu1  ;;  %v1807_v11 = vsel %vm1779_vm0, %v4254_v1, -inf }
 0x86e   : > { %1808 = vmax.xlane.f32.xlu1 %v1807_v11  ;;  %v1804_v36 = vsel %vm1779_vm0, %v4256_v9, -inf }
 0x86f   : > { %1805 = vmax.xlane.f32.xlu0 %v1804_v36 }
 0x870   : > { %v4262_v38 = vpop.f32.mrb[46].mxu1 }
 0x871   : > { %v4264_v41 = vpop.f32.mrb[47].mxu1  ;;  %v1813_v35 = vsel %vm1779_vm0, %v4262_v38, -inf }
 0x872   : > { %1814 = vmax.xlane.f32.xlu1 %v1813_v35  ;;  %v1810_v12 = vsel %vm1779_vm0, %v4264_v41, -inf }
 0x873   : > { %1811 = vmax.xlane.f32.xlu0 %v1810_v12 }
 0x874   : > { %v4270_v14 = vpop.f32.mrb[48].mxu1 }
 0x875   : > { %v4272_v5 = vpop.f32.mrb[49].mxu1  ;;  %v1819_v17 = vsel %vm1779_vm0, %v4270_v14, -inf }
 0x876   : > { %1820 = vmax.xlane.f32.xlu1 %v1819_v17  ;;  %v1816_v16 = vsel %vm1779_vm0, %v4272_v5, -inf }
 0x877   : > { %1817 = vmax.xlane.f32.xlu0 %v1816_v16 }
 0x878   : > { %v4278_v50 = vpop.f32.mrb[50].mxu1 }
 0x879   : > { %v4280_v20 = vpop.f32.mrb[51].mxu1  ;;  %v1825_v43 = vsel %vm1779_vm0, %v4278_v50, -inf }
 0x87a   : > { %v1822_v55 = vsel %vm1779_vm0, %v4280_v20, -inf  ;;  %1826 = vmax.xlane.f32.xlu1 %v1825_v43 }
 0x87b   : > { %1823 = vmax.xlane.f32.xlu0 %v1822_v55 }
 0x8eb   : > { %v1785_v21 = vpop.xlane.xlu1 %1784 }
 0x8ec   : > { %v1829_v24 = vsub.f32 %v2875_v49, %v1785_v21  ;;  %v1782_v62 = vpop.xlane.xlu0 %1781 }
 0x8ed   : > { %v1828_v58 = vsub.f32 %v1700_v40, %v1782_v62 }
 0x8ee   : > { %v1846_v19 = vmul.f32 1.442695, %v1829_v24 }
 0x8ef   : > { %v1844_v57 = vmul.f32 1.442695, %v1828_v58  ;;  %v1791_v10 = vpop.xlane.xlu1 %1790 }
 0x8f0   : > { %3174 = vpow2.f32 %v1846_v19  ;;  %v1831_v3 = vsub.f32 %v2878_v46, %v1791_v10  ;;  %v1788_v13 = vpop.xlane.xlu0 %1787 }
 0x8f1   : > { %3176 = vpow2.f32 %v1844_v57  ;;  %v1830_v4 = vsub.f32 %v1710_v22, %v1788_v13 }
 0x8f2   : > { %v1850_v56 = vmul.f32 1.442695, %v1831_v3 }
 0x8f3   : > { %v1848_v28 = vmul.f32 1.442695, %v1830_v4  ;;  %v1797_v60 = vpop.xlane.xlu1 %1796 }
 0x8f4   : > { %3178 = vpow2.f32 %v1850_v56  ;;  %v1833_v6 = vsub.f32 %v2881_v59, %v1797_v60  ;;  %v1794_v34 = vpop.xlane.xlu0 %1793 }
 0x8f5   : > { %3180 = vpow2.f32 %v1848_v28  ;;  %v1832_v29 = vsub.f32 %v1720_v61, %v1794_v34 }
 0x8f6   : > { %v1854_v45 = vmul.f32 1.442695, %v1833_v6 }
 0x8f7   : > { %v1852_v54 = vmul.f32 1.442695, %v1832_v29  ;;  %v1803_v7 = vpop.xlane.xlu1 %1802 }
 0x8f8   : > { %3182 = vpow2.f32 %v1854_v45  ;;  %v1835_v2 = vsub.f32 %v2884_v30, %v1803_v7  ;;  %v1800_v23 = vpop.xlane.xlu0 %1799 }
 0x8f9   : > { %3184 = vpow2.f32 %v1852_v54  ;;  %v1834_v32 = vsub.f32 %v1730_v25, %v1800_v23 }
 0x8fa   : > { %v4286_v26 = vpop.eup %3174  ;;  %v1858_v15 = vmul.f32 1.442695, %v1835_v2 }
 0x8fb   : > { %v4288_v37 = vpop.eup %3176  ;;  %v1856_v39 = vmul.f32 1.442695, %v1834_v32  ;;  %v1809_v18 = vpop.xlane.xlu1 %1808  ;;  %v1879_v42 = vsel %vm1779_vm0, %v4286_v26, 0.0 }
 0x8fc   : > { %3186 = vpow2.f32 %v1858_v15  ;;  %v1837_v44 = vsub.f32 %v4254_v1, %v1809_v18  ;;  %v1806_v33 = vpop.xlane.xlu0 %1805  ;;  %1880 = vadd.xlane.f32.xlu1 %v1879_v42  ;;  %v1876_v48 = vsel %vm1779_vm0, %v4288_v37, 0.0 }
 0x8fd   : > { %3188 = vpow2.f32 %v1856_v39  ;;  %v1836_v49 = vsub.f32 %v4256_v9, %v1806_v33  ;;  %1877 = vadd.xlane.f32.xlu0 %v1876_v48 }
 0x8fe   : > { %v4296_v40 = vpop.eup %3178  ;;  %v1862_v47 = vmul.f32 1.442695, %v1837_v44 }
 0x8ff   : > { %v4298_v53 = vpop.eup %3180  ;;  %v1860_v46 = vmul.f32 1.442695, %v1836_v49  ;;  %v1815_v22 = vpop.xlane.xlu1 %1814  ;;  %v1885_v27 = vsel %vm1779_vm0, %v4296_v40, 0.0 }
 0x900   : > { %3190 = vpow2.f32 %v1862_v47  ;;  %v1839_v52 = vsub.f32 %v4262_v38, %v1815_v22  ;;  %v1812_v59 = vpop.xlane.xlu0 %1811  ;;  %1886 = vadd.xlane.f32.xlu1 %v1885_v27  ;;  %v1882_v61 = vsel %vm1779_vm0, %v4298_v53, 0.0 }
 0x901   : > { %3192 = vpow2.f32 %v1860_v46  ;;  %v1838_v51 = vsub.f32 %v4264_v41, %v1812_v59  ;;  %1883 = vadd.xlane.f32.xlu0 %v1882_v61 }
 0x902   : > { %v4306_v31 = vpop.eup %3182  ;;  %v1866_v30 = vmul.f32 1.442695, %v1839_v52 }
 0x903   : > { %v4308_v25 = vpop.eup %3184  ;;  %v1864_v0 = vmul.f32 1.442695, %v1838_v51  ;;  %v1821_v63 = vpop.xlane.xlu1 %1820  ;;  %v1891_v1 = vsel %vm1779_vm0, %v4306_v31, 0.0 }
 0x904   : > { %3194 = vpow2.f32 %v1866_v30  ;;  %v1841_v9 = vsub.f32 %v4270_v14, %v1821_v63  ;;  %v1818_v11 = vpop.xlane.xlu0 %1817  ;;  %1892 = vadd.xlane.f32.xlu1 %v1891_v1  ;;  %v1888_v36 = vsel %vm1779_vm0, %v4308_v25, 0.0 }
 0x905   : > { %3196 = vpow2.f32 %v1864_v0  ;;  %v1840_v38 = vsub.f32 %v4272_v5, %v1818_v11  ;;  %1889 = vadd.xlane.f32.xlu0 %v1888_v36 }
 0x906   : > { %v4316_v41 = vpop.eup %3186  ;;  %v1870_v35 = vmul.f32 1.442695, %v1841_v9 }
 0x907   : > { %v4318_v12 = vpop.eup %3188  ;;  %v1868_v17 = vmul.f32 1.442695, %v1840_v38  ;;  %v1827_v16 = vpop.xlane.xlu1 %1826  ;;  %v1897_v43 = vsel %vm1779_vm0, %v4316_v41, 0.0 }
 0x908   : > { %3198 = vpow2.f32 %v1870_v35  ;;  %v1843_v14 = vsub.f32 %v4278_v50, %v1827_v16  ;;  %1898 = vadd.xlane.f32.xlu1 %v1897_v43  ;;  %v1824_v55 = vpop.xlane.xlu0 %1823  ;;  %v1894_v21 = vsel %vm1779_vm0, %v4318_v12, 0.0 }
 0x909   : > { %3200 = vpow2.f32 %v1868_v17  ;;  %v1842_v5 = vsub.f32 %v4280_v20, %v1824_v55  ;;  %1895 = vadd.xlane.f32.xlu0 %v1894_v21 }
 0x90a   : > { %v4326_v24 = vpop.eup %3190  ;;  %v1874_v62 = vmul.f32 1.442695, %v1843_v14 }
 0x90b   : > { %v4328_v58 = vpop.eup %3192  ;;  %v1872_v19 = vmul.f32 1.442695, %v1842_v5  ;;  %v1903_v57 = vsel %vm1779_vm0, %v4326_v24, 0.0 }
 0x90c   : > { %3202 = vpow2.f32 %v1874_v62  ;;  %1904 = vadd.xlane.f32.xlu1 %v1903_v57  ;;  %v1900_v50 = vsel %vm1779_vm0, %v4328_v58, 0.0 }
 0x90d   : > { %3204 = vpow2.f32 %v1872_v19  ;;  %1901 = vadd.xlane.f32.xlu0 %v1900_v50 }
 0x90e   : > { %v4334_v10 = vpop.eup %3194 }
 0x90f   : > { %v4336_v20 = vpop.eup %3196  ;;  %v1909_v3 = vsel %vm1779_vm0, %v4334_v10, 0.0 }
 0x910   : > { %1910 = vadd.xlane.f32.xlu1 %v1909_v3  ;;  %v1906_v13 = vsel %vm1779_vm0, %v4336_v20, 0.0 }
 0x911   : > { %1907 = vadd.xlane.f32.xlu0 %v1906_v13 }
 0x912   : > { %v4342_v4 = vpop.eup %3198 }
 0x913   : > { %v4344_v56 = vpop.eup %3200  ;;  %v1915_v28 = vsel %vm1779_vm0, %v4342_v4, 0.0 }
 0x914   : > { %1916 = vadd.xlane.f32.xlu1 %v1915_v28  ;;  %v1912_v60 = vsel %vm1779_vm0, %v4344_v56, 0.0 }
 0x915   : > { %1913 = vadd.xlane.f32.xlu0 %v1912_v60 }
 0x916   : > { %v4350_v6 = vpop.eup %3202 }
 0x917   : > { %v4352_v34 = vpop.eup %3204  ;;  %v1921_v29 = vsel %vm1779_vm0, %v4350_v6, 0.0 }
 0x918   : > { %1922 = vadd.xlane.f32.xlu1 %v1921_v29  ;;  %v1918_v45 = vsel %vm1779_vm0, %v4352_v34, 0.0 }
 0x919   : > { %1919 = vadd.xlane.f32.xlu0 %v1918_v45 }
 0x989   : > { %v1881_v54 = vpop.xlane.xlu1 %1880 }
 0x98a   : > { %v1925_v7 = vmul.f32 0.0025, %v1881_v54  ;;  %v1878_v2 = vpop.xlane.xlu0 %1877 }
 0x98b   : > { %v1924_v23 = vmul.f32 0.0025, %v1878_v2 }
 0x98c   : > { %vm1941_vm4 = vcmp.gt.f32.partialorder %v4286_v26, %v1925_v7 }
 0x98d   : > { %vm1940_vm5 = vcmp.gt.f32.partialorder %v4288_v37, %v1924_v23  ;;  %v1887_v32 = vpop.xlane.xlu1 %1886  ;;  %v4363_v15 = vsel %vm1941_vm4, %v4286_v26, 0.0 }
 0x98e   : > { %v1927_v39 = vmul.f32 0.0025, %v1887_v32  ;;  %v1884_v18 = vpop.xlane.xlu0 %1883  ;;  %v1975_v42 = vsel %vm1779_vm0, %v4363_v15, 0.0  ;;  %v4368_v44 = vsel %vm1940_vm5, %v4288_v37, 0.0 }
 0x98f   : > { %v1926_v8 = vmul.f32 0.0025, %v1884_v18  ;;  %1976 = vadd.xlane.f32.xlu1 %v1975_v42  ;;  %v1972_v33 = vsel %vm1779_vm0, %v4368_v44, 0.0 }
 0x990   : > { %vm1943_vm6 = vcmp.gt.f32.partialorder %v4296_v40, %v1927_v39  ;;  %1973 = vadd.xlane.f32.xlu0 %v1972_v33 }
 0x991   : > { %vm1942_vm7 = vcmp.gt.f32.partialorder %v4298_v53, %v1926_v8  ;;  %v1893_v26 = vpop.xlane.xlu1 %1892  ;;  %v4375_v48 = vsel %vm1943_vm6, %v4296_v40, 0.0 }
 0x992   : > { %v1929_v49 = vmul.f32 0.0025, %v1893_v26  ;;  %v1890_v47 = vpop.xlane.xlu0 %1889  ;;  %v1981_v37 = vsel %vm1779_vm0, %v4375_v48, 0.0  ;;  %v4380_v46 = vsel %vm1942_vm7, %v4298_v53, 0.0 }
 0x993   : > { %v1928_v22 = vmul.f32 0.0025, %v1890_v47  ;;  %1982 = vadd.xlane.f32.xlu1 %v1981_v37  ;;  %v1978_v27 = vsel %vm1779_vm0, %v4380_v46, 0.0 }
 0x994   : > { %vm1945_vm8 = vcmp.gt.f32.partialorder %v4306_v31, %v1929_v49  ;;  %1979 = vadd.xlane.f32.xlu0 %v1978_v27 }
 0x995   : > { %vm1944_vm9 = vcmp.gt.f32.partialorder %v4308_v25, %v1928_v22  ;;  %v1899_v40 = vpop.xlane.xlu1 %1898  ;;  %v4387_v52 = vsel %vm1945_vm8, %v4306_v31, 0.0 }
 0x996   : > { %v1931_v59 = vmul.f32 0.0025, %v1899_v40  ;;  %v1896_v61 = vpop.xlane.xlu0 %1895  ;;  %v1987_v53 = vsel %vm1779_vm0, %v4387_v52, 0.0  ;;  %v4392_v51 = vsel %vm1944_vm9, %v4308_v25, 0.0 }
 0x997   : > { %v1930_v30 = vmul.f32 0.0025, %v1896_v61  ;;  %1988 = vadd.xlane.f32.xlu1 %v1987_v53  ;;  %v1984_v0 = vsel %vm1779_vm0, %v4392_v51, 0.0 }
 0x998   : > { %vm1947_vm10 = vcmp.gt.f32.partialorder %v4316_v41, %v1931_v59  ;;  %1985 = vadd.xlane.f32.xlu0 %v1984_v0 }
 0x999   : > { %vm1946_vm11 = vcmp.gt.f32.partialorder %v4318_v12, %v1930_v30  ;;  %v1905_v31 = vpop.xlane.xlu1 %1904  ;;  %v4399_v63 = vsel %vm1947_vm10, %v4316_v41, 0.0 }
 0x99a   : > { %v1933_v1 = vmul.f32 0.0025, %v1905_v31  ;;  %v1902_v9 = vpop.xlane.xlu0 %1901  ;;  %v1993_v25 = vsel %vm1779_vm0, %v4399_v63, 0.0  ;;  %v4404_v11 = vsel %vm1946_vm11, %v4318_v12, 0.0 }
 0x99b   : > { %v1932_v36 = vmul.f32 0.0025, %v1902_v9  ;;  %1994 = vadd.xlane.f32.xlu1 %v1993_v25  ;;  %v1990_v38 = vsel %vm1779_vm0, %v4404_v11, 0.0 }
 0x99c   : > { %vm1949_vm12 = vcmp.gt.f32.partialorder %v4326_v24, %v1933_v1  ;;  %1991 = vadd.xlane.f32.xlu0 %v1990_v38 }
 0x99d   : > { %vm1948_vm13 = vcmp.gt.f32.partialorder %v4328_v58, %v1932_v36  ;;  %v1911_v41 = vpop.xlane.xlu1 %1910  ;;  %v4411_v35 = vsel %vm1949_vm12, %v4326_v24, 0.0 }
 0x99e   : > { %v1935_v17 = vmul.f32 0.0025, %v1911_v41  ;;  %v1908_v16 = vpop.xlane.xlu0 %1907  ;;  %v1999_v12 = vsel %vm1779_vm0, %v4411_v35, 0.0  ;;  %v4416_v43 = vsel %vm1948_vm13, %v4328_v58, 0.0 }
 0x99f   : > { %v1934_v14 = vmul.f32 0.0025, %v1908_v16  ;;  %2000 = vadd.xlane.f32.xlu1 %v1999_v12  ;;  %v1996_v55 = vsel %vm1779_vm0, %v4416_v43, 0.0 }
 0x9a0   : > { %vm1951_vm14 = vcmp.gt.f32.partialorder %v4334_v10, %v1935_v17  ;;  %1997 = vadd.xlane.f32.xlu0 %v1996_v55 }
 0x9a1   : > { %vm1950_vm15 = vcmp.gt.f32.partialorder %v4336_v20, %v1934_v14  ;;  %v1917_v21 = vpop.xlane.xlu1 %1916  ;;  %v4423_v5 = vsel %vm1951_vm14, %v4334_v10, 0.0 }
 0x9a2   : > { %v1937_v24 = vmul.f32 0.0025, %v1917_v21  ;;  %v1914_v62 = vpop.xlane.xlu0 %1913  ;;  %v2005_v58 = vsel %vm1779_vm0, %v4423_v5, 0.0  ;;  %v4428_v19 = vsel %vm1950_vm15, %v4336_v20, 0.0 }
 0x9a3   : > { %v1936_v57 = vmul.f32 0.0025, %v1914_v62  ;;  %2006 = vadd.xlane.f32.xlu1 %v2005_v58  ;;  %v2002_v50 = vsel %vm1779_vm0, %v4428_v19, 0.0 }
 0x9a4   : > { %vm1953_vm1 = vcmp.gt.f32.partialorder %v4342_v4, %v1937_v24  ;;  %2003 = vadd.xlane.f32.xlu0 %v2002_v50 }
 0x9a5   : > { %vm1952_vm2 = vcmp.gt.f32.partialorder %v4344_v56, %v1936_v57  ;;  %v1923_v10 = vpop.xlane.xlu1 %1922  ;;  %v4435_v3 = vsel %vm1953_vm1, %v4342_v4, 0.0 }
 0x9a6   : > { %v1939_v13 = vmul.f32 0.0025, %v1923_v10  ;;  %v1920_v28 = vpop.xlane.xlu0 %1919  ;;  %v2011_v20 = vsel %vm1779_vm0, %v4435_v3, 0.0  ;;  %v4440_v60 = vsel %vm1952_vm2, %v4344_v56, 0.0 }
 0x9a7   : > { %v1938_v29 = vmul.f32 0.0025, %v1920_v28  ;;  %2012 = vadd.xlane.f32.xlu1 %v2011_v20  ;;  %v2008_v45 = vsel %vm1779_vm0, %v4440_v60, 0.0 }
 0x9a8   : > { %vm1955_vm3 = vcmp.gt.f32.partialorder %v4350_v6, %v1939_v13  ;;  %2009 = vadd.xlane.f32.xlu0 %v2008_v45 }
 0x9a9   : > { %vm1954_vm4 = vcmp.gt.f32.partialorder %v4352_v34, %v1938_v29  ;;  %v4447_v4 = vsel %vm1955_vm3, %v4350_v6, 0.0 }
 0x9aa   : > { %v2017_v54 = vsel %vm1779_vm0, %v4447_v4, 0.0  ;;  %v4452_v7 = vsel %vm1954_vm4, %v4352_v34, 0.0 }
 0x9ab   : > { %2018 = vadd.xlane.f32.xlu1 %v2017_v54  ;;  %v2014_v56 = vsel %vm1779_vm0, %v4452_v7, 0.0 }
 0x9ac   : > { %2015 = vadd.xlane.f32.xlu0 %v2014_v56 }
 0xa1c   : > { %v1977_v2 = vpop.xlane.xlu1 %1976 }
 0xa1d   : > { %v2021_v23 = vmax.f32 %v1977_v2, 1e-12  ;;  %v1974_v32 = vpop.xlane.xlu0 %1973 }
 0xa1e   : > { %v2020_v39 = vmax.f32 %v1974_v32, 1e-12 }
 0xa1f   : > { %3206 = vrcp.f32 %v2021_v23 }
 0xa20   : > { %3208 = vrcp.f32 %v2020_v39  ;;  %v1983_v18 = vpop.xlane.xlu1 %1982 }
 0xa21   : > { %v2023_v6 = vmax.f32 %v1983_v18, 1e-12  ;;  %v1980_v42 = vpop.xlane.xlu0 %1979 }
 0xa22   : > { %v2022_v8 = vmax.f32 %v1980_v42, 1e-12 }
 0xa23   : > { %3210 = vrcp.f32 %v2023_v6 }
 0xa24   : > { %3212 = vrcp.f32 %v2022_v8  ;;  %v1989_v33 = vpop.xlane.xlu1 %1988 }
 0xa25   : > { %v2025_v34 = vmax.f32 %v1989_v33, 1e-12  ;;  %v1986_v26 = vpop.xlane.xlu0 %1985 }
 0xa26   : > { %v2024_v49 = vmax.f32 %v1986_v26, 1e-12 }
 0xa27   : > { %3214 = vrcp.f32 %v2025_v34 }
 0xa28   : > { %3216 = vrcp.f32 %v2024_v49  ;;  %v1995_v47 = vpop.xlane.xlu1 %1994 }
 0xa29   : > { %v3207_v37 = vpop.eup %3206  ;;  %v2027_v22 = vmax.f32 %v1995_v47, 1e-12  ;;  %v1992_v27 = vpop.xlane.xlu0 %1991 }
 0xa2a   : > { %v3209_v40 = vpop.eup %3208  ;;  %v2026_v59 = vmax.f32 %v1992_v27, 1e-12  ;;  %v2069_v53 = vmul.f32 %v3207_v37, %v4363_v15 }
 0xa2b   : > { %3218 = vrcp.f32 %v2027_v22  ;;  %v2068_v61 = vmul.f32 %v3209_v40, %v4368_v44 }
 0xa2c   : > { %3220 = vrcp.f32 %v2026_v59  ;;  %v2001_v30 = vpop.xlane.xlu1 %2000 }
 0xa2d   : > { %v3211_v0 = vpop.eup %3210  ;;  %v2029_v31 = vmax.f32 %v2001_v30, 1e-12  ;;  %2899 = vmatprep.mubr.msk.f32.mxu0 %vm1779_vm0, %v2068_v61  ;;  %v1998_v1 = vpop.xlane.xlu0 %1997 }
 0xa2e   : > { %v3213_v9 = vpop.eup %3212  ;;  %v2028_v25 = vmax.f32 %v1998_v1, 1e-12  ;;  %2900 = vmatmul.mubr.msk.f32.vlgmr.msra.gmra.mrb[28].mxu0 %vm1779_vm0, %v2069_v53  ;;  %v2071_v44 = vmul.f32 %v3211_v0, %v4375_v48 }
 0xa2f   : > { %3222 = vrcp.f32 %v2029_v31  ;;  %v2070_v36 = vmul.f32 %v3213_v9, %v4380_v46 }
 0xa30   : > { %3224 = vrcp.f32 %v2028_v25  ;;  %v2007_v38 = vpop.xlane.xlu1 %2006 }
 0xa31   : > { %v3215_v41 = vpop.eup %3214  ;;  %v2031_v15 = vmax.f32 %v2007_v38, 1e-12  ;;  %2902 = vmatprep.mubr.msk.f32.mxu0 %vm1779_vm0, %v2070_v36  ;;  %v2004_v17 = vpop.xlane.xlu0 %2003 }
 0xa32   : > { %v3217_v16 = vpop.eup %3216  ;;  %v2030_v12 = vmax.f32 %v2004_v17, 1e-12  ;;  %2903 = vmatmul.mubr.msk.f32.gmra.mrb[30].mxu0 %vm1779_vm0, %v2071_v44  ;;  %v2073_v46 = vmul.f32 %v3215_v41, %v4387_v52 }
 0xa33   : > { %3226 = vrcp.f32 %v2031_v15  ;;  %v2072_v14 = vmul.f32 %v3217_v16, %v4392_v51 }
 0xa34   : > { %3228 = vrcp.f32 %v2030_v12  ;;  %v2013_v55 = vpop.xlane.xlu1 %2012 }
 0xa35   : > { %v3219_v21 = vpop.eup %3218  ;;  %v2033_v24 = vmax.f32 %v2013_v55, 1e-12  ;;  %2905 = vmatprep.mubr.msk.f32.mxu0 %vm1779_vm0, %v2072_v14  ;;  %v2010_v48 = vpop.xlane.xlu0 %2009 }
 0xa36   : > { %v3221_v62 = vpop.eup %3220  ;;  %v2032_v58 = vmax.f32 %v2010_v48, 1e-12  ;;  %2906 = vmatmul.mubr.msk.f32.gmra.mrb[32].mxu0 %vm1779_vm0, %v2073_v46  ;;  %v2075_v51 = vmul.f32 %v3219_v21, %v4399_v63 }
 0xa37   : > { %3230 = vrcp.f32 %v2033_v24  ;;  %v2074_v57 = vmul.f32 %v3221_v62, %v4404_v11 }
 0xa38   : > { %3232 = vrcp.f32 %v2032_v58  ;;  %v2019_v50 = vpop.xlane.xlu1 %2018 }
 0xa39   : > { %v3223_v10 = vpop.eup %3222  ;;  %v2035_v13 = vmax.f32 %v2019_v50, 1e-12  ;;  %2908 = vmatprep.mubr.msk.f32.mxu0 %vm1779_vm0, %v2074_v57  ;;  %v2016_v52 = vpop.xlane.xlu0 %2015 }
 0xa3a   : > { %v3225_v28 = vpop.eup %3224  ;;  %v2034_v20 = vmax.f32 %v2016_v52, 1e-12  ;;  %2909 = vmatmul.mubr.msk.f32.gmra.mrb[34].mxu0 %vm1779_vm0, %v2075_v51  ;;  %v2077_v45 = vmul.f32 %v3223_v10, %v4411_v35 }
 0xa3b   : > { %3234 = vrcp.f32 %v2035_v13  ;;  %v2076_v29 = vmul.f32 %v3225_v28, %v4416_v43 }
 0xa3c   : > { %3236 = vrcp.f32 %v2034_v20 }
 0xa3d   : > { %v3227_v11 = vpop.eup %3226  ;;  %2911 = vmatprep.mubr.msk.f32.mxu0 %vm1779_vm0, %v2076_v29 }
 0xa3e   : > { %v3229_v54 = vpop.eup %3228  ;;  %2912 = vmatmul.mubr.msk.f32.gmra.mrb[36].mxu0 %vm1779_vm0, %v2077_v45  ;;  %v2079_v56 = vmul.f32 %v3227_v11, %v4423_v5 }
 0xa3f   : > { %v2078_v63 = vmul.f32 %v3229_v54, %v4428_v19 }
 0xa41   : > { %v3231_v2 = vpop.eup %3230  ;;  %2914 = vmatprep.mubr.msk.f32.mxu0 %vm1779_vm0, %v2078_v63 }
 0xa42   : > { %v3233_v43 = vpop.eup %3232  ;;  %2915 = vmatmul.mubr.msk.f32.gmra.mrb[38].mxu0 %vm1779_vm0, %v2079_v56  ;;  %v2081_v23 = vmul.f32 %v3231_v2, %v4435_v3 }
 0xa43   : > { %v2080_v35 = vmul.f32 %v3233_v43, %v4440_v60 }
 0xa45   : > { %v3235_v32 = vpop.eup %3234  ;;  %2917 = vmatprep.mubr.msk.f32.mxu0 %vm1779_vm0, %v2080_v35 }
 0xa46   : > { %v3237_v19 = vpop.eup %3236  ;;  %2918 = vmatmul.mubr.msk.f32.gmra.mrb[40].mxu0 %vm1779_vm0, %v2081_v23  ;;  %v2083_v39 = vmul.f32 %v3235_v32, %v4447_v4 }
 0xa47   : > { %v2082_v5 = vmul.f32 %v3237_v19, %v4452_v7 }
 0xa49   : > { %2920 = vmatprep.mubr.msk.f32.mxu0 %vm1779_vm0, %v2082_v5 }
 0xa4a   : > { %2921 = vmatmul.mubr.msk.f32.gmra.mrb[42].mxu0 %vm1779_vm0, %v2083_v39 }
 0xa4b   : > { %3337 = shalt.err (!%p3334_p7)
}
 0xa4c   : > { %s3338_s27 = scalar_lea.hbm %s4496_s15, 2048  ;;  %s3342_s11 = scalar_lea.hbm %s4641_s5, 8192 }
 0xa4d   : > { %p3339_p9 = scmp.ne.s32.totalorder %s4496_s15, %s3338_s27  ;;  %p3343_p5 = scmp.lt.u32.totalorder %s4496_s15, %s4641_s5 }
 0xa4e   : > { %p3344_p10 = scmp.lt.u32.totalorder %s3342_s11, %s3338_s27  ;;  %p3346_p2 = scmp.lt.u32.totalorder %s3338_s27, %s4496_s15 }
 0xa4f   : > { %p3340_p12 = pnand %p3339_p9, %p3621_p6 }
 0xa50   : > { %p3345_p1 = por %p3344_p10, %p3343_p5 }
 0xa51   : > { %p3341_p0 = pneg %p3340_p12 }
 0xa52   : > { %p3347_p4 = por %p3346_p2, %p3345_p1 }
 0xa54   : > { %p3348_p8 = pnand %p3347_p4, %p3341_p0 }
 0xa56   : > { %3351 = shalt.err (!%p3348_p8)
}
 0xa57   : > { %s3462_s9 = smov 128   ;;  %s3463_s18 = smov 8  }
 0xa58   : > { %2976 = dma.vmem_to_hbm [thread:$0]  (%p3621_p6), %s4499_s10, 2048, %s4496_s15, %s4501_s17, %s3462_s9, %s3462_s9, %s3463_s18  }
 0xa59   : > { %s4532_s27 = scalar_lea.hbm %s4642_s6, %s4490_s30  ;;  %s2385_s7 = sshll.u32 %s4228_s20, 4  ;;  %s4535_s7 = int_to_ptr.vmem [resolvable:$true] %s2385_s7 }
 0xa5a   : > { %s3352_s11 = scalar_lea.vmem %s4535_s7, 2048  ;;  %s3464_s14 = smov [#allocation11]  }
 0xa5b   : > { %p3353_p11 = scmp.ne.s32.totalorder %s4535_s7, %s3352_s11  ;;  %s3356_s25 = sshll.u32 %s3464_s14, 4  ;;  %s3357_s25 = int_to_ptr.vmem [resolvable:$false] %s3356_s25 }
 0xa5c   : > { %s3358_s15 = scalar_lea.vmem %s3357_s25, 4096  ;;  %p3359_p7 = scmp.lt.s32.totalorder %s4535_s7, %s3357_s25 }
 0xa5d   : > { %p3354_p13 = pnand %p3353_p11, %p3621_p6  ;;  %p3360_p9 = scmp.lt.s32.totalorder %s3358_s15, %s3352_s11 }
 0xa5f   : > { %p3355_p3 = pneg %p3354_p13  ;;  %p3361_p12 = por %p3360_p9, %p3359_p7 }
 0xa61   : > { %p3362_p0 = pnand %p3361_p12, %p3355_p3 }
 0xa63   : > { %3365 = shalt.err (!%p3362_p0)
}
 0xa64   : > { %s3366_s20 = scalar_lea.hbm %s4532_s27, 2048  ;;  %s3370_s19 = scalar_lea.hbm %s4642_s6, 8192 }
 0xa65   : > { %p3367_p5 = scmp.ne.s32.totalorder %s4532_s27, %s3366_s20  ;;  %p3371_p2 = scmp.lt.u32.totalorder %s4532_s27, %s4642_s6 }
 0xa66   : > { %p3372_p4 = scmp.lt.u32.totalorder %s3370_s19, %s3366_s20  ;;  %p3374_p11 = scmp.lt.u32.totalorder %s3366_s20, %s4532_s27 }
 0xa67   : > { %p3368_p10 = pnand %p3367_p5, %p3621_p6 }
 0xa68   : > { %p3373_p8 = por %p3372_p4, %p3371_p2 }
 0xa69   : > { %p3369_p1 = pneg %p3368_p10 }
 0xa6a   : > { %p3375_p13 = por %p3374_p11, %p3373_p8 }
 0xa6c   : > { %p3376_p3 = pnand %p3375_p13, %p3369_p1 }
 0xa6e   : > { %3379 = shalt.err (!%p3376_p3)
}
 0xa6f   : > { %2977 = dma.vmem_to_hbm [thread:$0]  (%p3621_p6), %s4535_s7, 2048, %s4532_s27, %s4501_s17, %s3462_s9, %s3462_s9, %s3463_s18  }
 0xa70   : > { %s4563_s11 = scalar_lea.vmem [#allocation8], %s3679_s16  ;;  %s4584_s7 = scalar_lea.hbm %s4640_s4, %s4490_s30 }
 0xa71   : > { %s2353_s16 = sshll.u32 %s4563_s11, 4  ;;  %s2330_s15 = scalar_lea.sflag [#allocation4], %s3676_s26  ;;  %s4586_s16 = int_to_ptr.vmem [resolvable:$true] %s2353_s16 }
 0xa72   : > { %s3380_s20 = scalar_lea.vmem %s4586_s16, 2048  ;;  %s3465_s10 = smov [#allocation8]  }
 0xa73   : > { %p3381_p7 = scmp.ne.s32.totalorder %s4586_s16, %s3380_s20  ;;  %s3384_s29 = sshll.u32 %s3465_s10, 4  ;;  %s3385_s29 = int_to_ptr.vmem [resolvable:$false] %s3384_s29 }
 0xa74   : > { %s3386_s19 = scalar_lea.vmem %s3385_s29, 4096  ;;  %p3387_p0 = scmp.lt.s32.totalorder %s4586_s16, %s3385_s29 }
 0xa75   : > { %p3382_p9 = pnand %p3381_p7, %p3621_p6  ;;  %p3388_p5 = scmp.lt.s32.totalorder %s3386_s19, %s3380_s20 }
 0xa77   : > { %p3383_p12 = pneg %p3382_p9  ;;  %p3389_p10 = por %p3388_p5, %p3387_p0 }
 0xa79   : > { %p3390_p1 = pnand %p3389_p10, %p3383_p12 }
 0xb01   : > { %v2901_v3 = vpop.f32.mrb[28].mxu0 }
 0xb02   : > { %2282 = vst [vmem:[%s4563_s11 + $0x8] sm:$0xff] %v2901_v3  ;;  %v2202_v60 = vpop.f32.mrb[29].mxu0 }
 0xb03   : > { %2281 = vst [vmem:[%s4563_s11] sm:$0xff] %v2202_v60 }
 0xb05   : > { %v2904_v4 = vpop.f32.mrb[30].mxu0 }
 0xb06   : > { %2284 = vst [vmem:[%s4563_s11 + $0x18] sm:$0xff] %v2904_v4  ;;  %v2212_v7 = vpop.f32.mrb[31].mxu0 }
 0xb07   : > { %2283 = vst [vmem:[%s4563_s11 + $0x10] sm:$0xff] %v2212_v7 }
 0xb09   : > { %v2907_v18 = vpop.f32.mrb[32].mxu0 }
 0xb0a   : > { %2286 = vst [vmem:[%s4563_s11 + $0x28] sm:$0xff] %v2907_v18  ;;  %v2222_v6 = vpop.f32.mrb[33].mxu0 }
 0xb0b   : > { %2285 = vst [vmem:[%s4563_s11 + $0x20] sm:$0xff] %v2222_v6 }
 0xb0d   : > { %v2910_v42 = vpop.f32.mrb[34].mxu0 }
 0xb0e   : > { %2288 = vst [vmem:[%s4563_s11 + $0x38] sm:$0xff] %v2910_v42  ;;  %v2232_v8 = vpop.f32.mrb[35].mxu0 }
 0xb0f   : > { %2287 = vst [vmem:[%s4563_s11 + $0x30] sm:$0xff] %v2232_v8 }
 0xb11   : > { %v2913_v33 = vpop.f32.mrb[36].mxu0 }
 0xb12   : > { %2290 = vst [vmem:[%s4563_s11 + $0x48] sm:$0xff] %v2913_v33  ;;  %v2242_v34 = vpop.f32.mrb[37].mxu0 }
 0xb13   : > { %2289 = vst [vmem:[%s4563_s11 + $0x40] sm:$0xff] %v2242_v34 }
 0xb15   : > { %v2916_v26 = vpop.f32.mrb[38].mxu0 }
 0xb16   : > { %2292 = vst [vmem:[%s4563_s11 + $0x58] sm:$0xff] %v2916_v26  ;;  %v2252_v49 = vpop.f32.mrb[39].mxu0 }
 0xb17   : > { %2291 = vst [vmem:[%s4563_s11 + $0x50] sm:$0xff] %v2252_v49 }
 0xb19   : > { %v2919_v47 = vpop.f32.mrb[40].mxu0 }
 0xb1a   : > { %2294 = vst [vmem:[%s4563_s11 + $0x68] sm:$0xff] %v2919_v47  ;;  %v2262_v37 = vpop.f32.mrb[41].mxu0 }
 0xb1b   : > { %2293 = vst [vmem:[%s4563_s11 + $0x60] sm:$0xff] %v2262_v37 }
 0xb1d   : > { %v2922_v22 = vpop.f32.mrb[42].mxu0 }
 0xb1e   : > { %2296 = vst [vmem:[%s4563_s11 + $0x78] sm:$0xff] %v2922_v22  ;;  %v2272_v27 = vpop.f32.mrb[43].mxu0 }
 0xb1f   : > { %2295 = vst [vmem:[%s4563_s11 + $0x70] sm:$0xff] %v2272_v27 }
 0xb20   : > { %3393 = shalt.err (!%p3390_p1)
}
 0xb21   : > { %s3394_s30 = scalar_lea.hbm %s4584_s7, 2048  ;;  %s3398_s11 = scalar_lea.hbm %s4640_s4, 8192 }
 0xb22   : > { %p3395_p2 = scmp.ne.s32.totalorder %s4584_s7, %s3394_s30  ;;  %p3399_p11 = scmp.lt.u32.totalorder %s4584_s7, %s4640_s4 }
 0xb23   : > { %p3400_p13 = scmp.lt.u32.totalorder %s3398_s11, %s3394_s30  ;;  %p3402_p7 = scmp.lt.u32.totalorder %s3394_s30, %s4584_s7 }
 0xb24   : > { %p3396_p4 = pnand %p3395_p2, %p3621_p6 }
 0xb25   : > { %p3401_p3 = por %p3400_p13, %p3399_p11 }
 0xb26   : > { %p3397_p8 = pneg %p3396_p4 }
 0xb27   : > { %p3403_p9 = por %p3402_p7, %p3401_p3 }
 0xb29   : > { %p3404_p12 = pnand %p3403_p9, %p3397_p8 }
 0xb2b   : > { %3407 = shalt.err (!%p3404_p12)
}
 0xb2c   : > { %2975 = dma.vmem_to_hbm [thread:$0]  (%p3621_p6), %s4586_s16, 2048, %s4584_s7, %s2330_s15, %s3462_s9, %s3462_s9, %s3463_s18  }
 0xb2d PF: > { %p3007_p0 = scmp.ge.s32.totalorder %s3454_s24, 2  ;;  %s2400_s20 = sand.u32 1, %s3442_s21  }
 0xb2e   : > { %p4658_p5 = scmp.ne.s32.totalorder %s4648_s28, 0  ;;  %s2401_s10 = scalar_lea.sflag [#allocation4], %s2400_s20 }
 0xb30   : > { %p2993_p10 = pnand %p3007_p0, %p4658_p5 }
 0xb32   : > { %3433 = dma.done.wait (!%p2993_p10), %s2401_s10, 2048  }
 0xb33   : > { %3435 = vsyncadd (!%p2993_p10), %s2401_s10, 4294965248  ;;  %s4659_s12 = sadd.s32 4294967294, %s3454_s24  }
 0xb34   : > { %s2409_s29 = sand.u32 1, %s4659_s12  }
 0xb35   : > { %s2410_s19 = scalar_lea.sflag [#allocation10], %s2409_s29 }
 0xb36   : > { %3437 = dma.done.wait (!%p2993_p10), %s2410_s19, 4096  }
 0xb37   : > { %3439 = vsyncadd (!%p2993_p10), %s2410_s19, 4294963200  ;;  %p24_p6 = scmp.ge.s32.totalorder %s3611_s8, 6   ;;  %s4660_s21 = smov %s3446_s22 }
 0xb38   : > { %s4661_s22 = smov %s3450_s23  ;;  %s4662_s23 = smov %s3627_s13 }
 0xb39   : > { %s4663_s24 = smov %s3611_s8  ;;  %26 = sbr.rel (!%p24_p6) target bundleno = 8 (0x8), region = 121 }
 0xb40   :  { %2424 = vsyncpa [#allocation3], 1 }
 0xb41   :  { %2426 = vsyncpa [#allocation3 + $0x1], 1 }
 0xb42   :  { %2427 = vsyncpa [#allocation6], 1 }
 0xb43   :  { %2428 = vsyncpa [#allocation4], 1 }
 0xb44   :  { %2430 = vsyncpa [#allocation4 + $0x1], 1 }
 0xb45   :  { %2431 = vsyncpa [#allocation10], 1 }
 0xb46   :  { %2433 = vsyncpa [#allocation10 + $0x1], 1 }

</bundles_post_ra>
